<compile_context>
chip_gen: v7x
topology: tpu7x:2x2x1
jax: 0.10.0
libtpu: 0.0.40
codegen_flags: <defaults>
</compile_context>

<pallas_src>
import jax
import jax.numpy as jnp
from jax.experimental import pallas as pl
from jax.experimental.pallas import tpu as pltpu

_EPS = 1e-5
_LANE = 128


def _round_up(x, m):
    return (x + m - 1) // m * m


# ---------------------------------------------------------------------------
# Pallas kernels: bf16 matmul(s) on the MXU (f32 accumulation) + f32 epilogue
# (folded-BN shift, optional residual, ReLU).
# ---------------------------------------------------------------------------
def _mm_shift_relu_kernel(a_ref, w_ref, shift_ref, o_ref):
    acc = jnp.dot(a_ref[...], w_ref[...], preferred_element_type=jnp.float32)
    o_ref[...] = jnp.maximum(acc + shift_ref[...], 0.0).astype(o_ref.dtype)


def _mm2_shift_relu_kernel(a_ref, w_ref, xs_ref, wsc_ref, shift_ref, o_ref):
    # conv2 matmul + fused 1x1 projection-shortcut matmul on the same M tile.
    acc = jnp.dot(a_ref[...], w_ref[...], preferred_element_type=jnp.float32)
    acc = acc + jnp.dot(xs_ref[...], wsc_ref[...],
                        preferred_element_type=jnp.float32)
    o_ref[...] = jnp.maximum(acc + shift_ref[...], 0.0).astype(o_ref.dtype)


def _mm_shift_res_relu_kernel(a_ref, w_ref, shift_ref, res_ref, o_ref):
    acc = jnp.dot(a_ref[...], w_ref[...], preferred_element_type=jnp.float32)
    o_ref[...] = jnp.maximum(acc + shift_ref[...] + res_ref[...],
                             0.0).astype(o_ref.dtype)


# ---------------------------------------------------------------------------
# Tiled launcher: grid over M; weights / shifts are passed whole (constant
# block across the grid), row-tiled operands get an (i, 0) index_map.
# ---------------------------------------------------------------------------
def _run_tiled(kernel, args, row_tiled, m_padded, n_padded, tile_m, out_dtype):
    grid = (m_padded // tile_m,)

    in_specs = []
    for a, tiled in zip(args, row_tiled):
        if tiled:
            in_specs.append(pl.BlockSpec((tile_m, a.shape[1]), lambda i: (i, 0)))
        else:
            in_specs.append(pl.BlockSpec(a.shape, lambda i: (0, 0)))
    out_spec = pl.BlockSpec((tile_m, n_padded), lambda i: (i, 0))

    # VMEM budget: every operand double-buffered by the BlockSpec pipeline.
    need = 2 * tile_m * n_padded * jnp.dtype(out_dtype).itemsize
    for a, tiled in zip(args, row_tiled):
        rows = tile_m if tiled else a.shape[0]
        need += 2 * rows * a.shape[1] * a.dtype.itemsize
    vmem_limit = int(min(max(need + (4 << 20), 32 << 20), 56 << 20))

    return pl.pallas_call(
        kernel,
        grid=grid,
        in_specs=in_specs,
        out_specs=out_spec,
        out_shape=jax.ShapeDtypeStruct((m_padded, n_padded), out_dtype),
        compiler_params=pltpu.CompilerParams(
            dimension_semantics=("parallel",),     # 2 TCs on v7x; no-op v5e/v6e
            vmem_limit_bytes=vmem_limit),
    )(*args)


# ---------------------------------------------------------------------------
# Glue: im2col, weight reshaping, BN folding, padding (cheap bookkeeping).
# ---------------------------------------------------------------------------
def _im2col(x_nhwc, ksize, stride, pad):
    N, H, W, C = x_nhwc.shape
    Ho = (H + 2 * pad - ksize) // stride + 1
    Wo = (W + 2 * pad - ksize) // stride + 1
    xp = jnp.pad(x_nhwc, ((0, 0), (pad, pad), (pad, pad), (0, 0)))
    cols = []
    for kh in range(ksize):
        for kw in range(ksize):
            cols.append(
                xp[:, kh:kh + Ho * stride:stride, kw:kw + Wo * stride:stride, :])
    patches = jnp.concatenate(cols, axis=-1)   # (kh, kw, C) order, C fastest
    return patches.reshape(N * Ho * Wo, ksize * ksize * C), (N, Ho, Wo)


def _w_to_mat(w_oihw, cin_pad=None):
    # [Cout, Cin, kh, kw] -> [kh*kw*Cin(pad), Cout], matching im2col order.
    cout, cin, kh, kw = w_oihw.shape
    w = jnp.transpose(w_oihw, (2, 3, 1, 0))    # [kh, kw, Cin, Cout]
    if cin_pad is not None and cin_pad > cin:
        w = jnp.pad(w, ((0, 0), (0, 0), (0, cin_pad - cin), (0, 0)))
    return w.reshape(-1, cout)


def _fold_bn(gamma, beta, mean, var):
    scale = gamma * jax.lax.rsqrt(var + _EPS)
    shift = beta - mean * scale
    return scale, shift


def _pad2d(a, rows, cols):
    return jnp.pad(a, ((0, rows - a.shape[0]), (0, cols - a.shape[1])))


def _pad_shift(shift, n_padded):
    return jnp.pad(shift, (0, n_padded - shift.shape[0])).reshape(1, n_padded)


# ---------------------------------------------------------------------------
# BasicBlock forward (Pallas).
# ---------------------------------------------------------------------------
def basic_block_forward(x_nchw, p, stride, *, tile_m=512):
    in_planes = x_nchw.shape[1]
    planes = p["conv1_w"].shape[0]
    has_projection = (stride != 1) or (in_planes != planes)

    # NCHW -> NHWC (layout plumbing only; fold into the caller when possible).
    x = jnp.transpose(x_nchw, (0, 2, 3, 1)).astype(jnp.float32)

    # ---- conv1 (3x3, stride, pad=1) + bn1 + relu ---------------------------
    a1, (N, Ho, Wo) = _im2col(x, 3, stride, 1)               # [M, 9*Cin] f32
    M = a1.shape[0]
    Np = _round_up(planes, _LANE)                            # lane-dense Cout
    K1 = _round_up(a1.shape[1], _LANE)

    tile = min(tile_m, _round_up(M, 8))
    Mp = _round_up(M, tile)

    s1, b1 = _fold_bn(p["bn1_gamma"], p["bn1_beta"], p["bn1_mean"], p["bn1_var"])
    w1 = _pad2d(_w_to_mat(p["conv1_w"]) * s1[None, :], K1, Np).astype(jnp.bfloat16)
    a1p = _pad2d(a1, Mp, K1).astype(jnp.bfloat16)
    sh1 = _pad_shift(b1, Np).astype(jnp.float32)

    out1 = _run_tiled(_mm_shift_relu_kernel, (a1p, w1, sh1),
                      (True, False, False), Mp, Np, tile, jnp.bfloat16)
    out1_nhwc = out1[:M].reshape(N, Ho, Wo, Np)     # padded channels are zero

    # ---- conv2 (3x3, stride=1, pad=1) + bn2 [+ shortcut] + add + relu ------
    # TODO(synk): fuse conv1->conv2 spatially (halo tiles kept in VMEM) so the
    # 9x im2col expansion of out1 never materializes in HBM; the bf16
    # intermediate above is the cheap mitigation.
    a2, _ = _im2col(out1_nhwc, 3, 1, 1)                      # [M, 9*Np] bf16
    a2p = _pad2d(a2, Mp, a2.shape[1])                        # K2 = 9*Np (mult of 128)

    s2, b2 = _fold_bn(p["bn2_gamma"], p["bn2_beta"], p["bn2_mean"], p["bn2_var"])
    w2 = _pad2d(_w_to_mat(p["conv2_w"], cin_pad=Np) * s2[None, :],
                9 * Np, Np).astype(jnp.bfloat16)

    if has_projection:
        # 1x1 strided projection shortcut, fused into the conv2 kernel.
        ssc, bsc = _fold_bn(p["sc_gamma"], p["sc_beta"], p["sc_mean"], p["sc_var"])
        Ksc = _round_up(in_planes, _LANE)
        xs = x[:, ::stride, ::stride, :].reshape(M, in_planes)
        xsp = _pad2d(xs, Mp, Ksc).astype(jnp.bfloat16)
        wsc = _pad2d(_w_to_mat(p["sc_w"]) * ssc[None, :], Ksc, Np
                     ).astype(jnp.bfloat16)
        sh = _pad_shift(b2 + bsc, Np).astype(jnp.float32)
        out = _run_tiled(_mm2_shift_relu_kernel, (a2p, w2, xsp, wsc, sh),
                         (True, False, True, False, False),
                         Mp, Np, tile, jnp.float32)
    else:
        # Identity shortcut: residual rides along as an f32 row tile.
        res = jnp.pad(x, ((0, 0), (0, 0), (0, 0), (0, Np - in_planes)))
        resp = _pad2d(res.reshape(M, Np), Mp, Np)
        sh = _pad_shift(b2, Np).astype(jnp.float32)
        out = _run_tiled(_mm_shift_res_relu_kernel, (a2p, w2, sh, resp),
                         (True, False, False, True),
                         Mp, Np, tile, jnp.float32)

    out = out[:M, :planes].reshape(N, Ho, Wo, planes)
    return jnp.transpose(out, (0, 3, 1, 2))                  # NHWC -> NCHW


# ---------------------------------------------------------------------------
# Pure-JAX f32 reference (for correctness check).
# ---------------------------------------------------------------------------
def _ref_forward(x, p, stride):
    in_planes = x.shape[1]
    planes = p["conv1_w"].shape[0]

    def conv(x, w, stride, pad):
        return jax.lax.conv_general_dilated(
            x, w, (stride, stride), ((pad, pad), (pad, pad)),
            dimension_numbers=("NCHW", "OIHW", "NCHW"))

    def bn(x, g, b, m, v):
        g, b, m, v = (t[None, :, None, None] for t in (g, b, m, v))
        return (x - m) / jnp.sqrt(v + _EPS) * g + b

    out = jax.nn.relu(bn(conv(x, p["conv1_w"], stride, 1),
                         p["bn1_gamma"], p["bn1_beta"], p["bn1_mean"], p["bn1_var"]))
    out = bn(conv(out, p["conv2_w"], 1, 1),
             p["bn2_gamma"], p["bn2_beta"], p["bn2_mean"], p["bn2_var"])
    if stride != 1 or in_planes != planes:
        sc = bn(conv(x, p["sc_w"], stride, 0),
                p["sc_gamma"], p["sc_beta"], p["sc_mean"], p["sc_var"])
    else:
        sc = x
    return jax.nn.relu(out + sc)


def _init_params(key, in_planes, planes):
    ks = jax.random.split(key, 16)
    p = {}
    p["conv1_w"] = 0.1 * jax.random.normal(ks[0], (planes, in_planes, 3, 3), jnp.float32)
    p["conv2_w"] = 0.1 * jax.random.normal(ks[1], (planes, planes, 3, 3), jnp.float32)
    p["sc_w"]    = 0.1 * jax.random.normal(ks[2], (planes, in_planes, 1, 1), jnp.float32)
    for i, tag in enumerate(("bn1", "bn2", "sc")):
        base = 3 + 4 * i
        p[f"{tag}_gamma"] = 1.0 + 0.1 * jax.random.normal(ks[base + 0], (planes,), jnp.float32)
        p[f"{tag}_beta"]  = 0.1 * jax.random.normal(ks[base + 1], (planes,), jnp.float32)
        p[f"{tag}_mean"]  = 0.1 * jax.random.normal(ks[base + 2], (planes,), jnp.float32)
        p[f"{tag}_var"]   = 0.5 + jnp.abs(jax.random.normal(ks[base + 3], (planes,), jnp.float32)) * 0.5
    return p


if __name__ == "__main__":
    key = jax.random.PRNGKey(0)
    fwd = jax.jit(basic_block_forward, static_argnums=(2,))

    def run_case(idx, in_planes, planes, stride, hw, batch=2):
        kx, kp = jax.random.split(jax.random.fold_in(key, idx))
        x = jax.random.normal(kx, (batch, in_planes, hw, hw), jnp.float32)
        params = _init_params(kp, in_planes, planes)
        out = jax.block_until_ready(fwd(x, params, stride))
        ref = jax.block_until_ready(_ref_forward(x, params, stride))
        assert out.shape == ref.shape, (out.shape, ref.shape)
        err = float(jnp.max(jnp.abs(out - ref)))
        # Matmul operands are bf16 (f32 accumulation) -> loose tolerance vs
        # the pure-f32 reference.
        assert jnp.allclose(out, ref, atol=5e-2, rtol=5e-2), err

    run_case(0, 4, 8, 2, 16)    # projection shortcut (stride=2, expand channels)
    run_case(1, 8, 8, 1, 16)    # identity shortcut
    print("KERNEL_OK")
</pallas_src>

<mosaic_0001>
module attributes {stable_mosaic.version = 11 : i64} {
  func.func @_mm_shift_relu_kernel(%arg0: i32, %arg1: memref<128x128xbf16, #tpu.memory_space<vmem>>, %arg2: memref<128x128xbf16, #tpu.memory_space<vmem>>, %arg3: memref<1x128xf32, #tpu.memory_space<vmem>>, %arg4: memref<128x128xbf16, #tpu.memory_space<vmem>>) attributes {dimension_semantics = [#tpu.dimension_semantics<parallel>], iteration_bounds = array<i64: 1>, scalar_prefetch = 0 : i64, scratch_operands = 0 : i64, tpu.core_type = #tpu.core_type<tc>, window_params = [{transform_indices = @transform_0, window_bounds = array<i64: 128, 128>}, {pipeline_mode = #tpu.pipeline_mode<synchronous>, transform_indices = @transform_1, window_bounds = array<i64: 128, 128>}, {pipeline_mode = #tpu.pipeline_mode<synchronous>, transform_indices = @transform_2, window_bounds = array<i64: 1, 128>}, {transform_indices = @transform_3, window_bounds = array<i64: 128, 128>}]} {
    %c0 = arith.constant 0 : index
    %c0_0 = arith.constant 0 : index
    %0 = vector.load %arg1[%c0, %c0_0] : memref<128x128xbf16, #tpu.memory_space<vmem>>, vector<128x128xbf16>
    %c0_1 = arith.constant 0 : index
    %c0_2 = arith.constant 0 : index
    %1 = vector.load %arg2[%c0_1, %c0_2] : memref<128x128xbf16, #tpu.memory_space<vmem>>, vector<128x128xbf16>
    %cst = arith.constant dense<0.000000e+00> : vector<128x128xf32>
    %2 = tpu.matmul %0, %1, %cst {dimension_numbers = #tpu.dot_dimension_numbers<[1], [0], [0], [1], [0, 0, 1, 1], [], []>} : vector<128x128xbf16>, vector<128x128xbf16>, vector<128x128xf32> -> vector<128x128xf32>
    %c0_3 = arith.constant 0 : index
    %c0_4 = arith.constant 0 : index
    %3 = vector.load %arg3[%c0_3, %c0_4] : memref<1x128xf32, #tpu.memory_space<vmem>>, vector<1x128xf32>
    %4 = vector.broadcast %3 : vector<1x128xf32> to vector<128x128xf32>
    %5 = arith.addf %2, %4 : vector<128x128xf32>
    %cst_5 = arith.constant 0.000000e+00 : f32
    %6 = vector.broadcast %cst_5 : f32 to vector<128x128xf32>
    %7 = arith.maximumf %5, %6 : vector<128x128xf32>
    %8 = arith.truncf %7 : vector<128x128xf32> to vector<128x128xbf16>
    %c0_6 = arith.constant 0 : index
    %c0_7 = arith.constant 0 : index
    %9 = vector.load %arg4[%c0_6, %c0_7] : memref<128x128xbf16, #tpu.memory_space<vmem>>, vector<128x128xbf16>
    tpu.vector_store %arg4[%c0_6, %c0_7], %8 {strides = array<i32>} : memref<128x128xbf16, #tpu.memory_space<vmem>>, vector<128x128xbf16>,
    return
  }
  func.func @transform_0(%arg0: i32) -> (i32, i32) {
    %c0_i32 = arith.constant 0 : i32
    %c0_i32_0 = arith.constant 0 : i32
    return %arg0, %c0_i32 : i32, i32
  }
  func.func @transform_1(%arg0: i32) -> (i32, i32) {
    %c0_i32 = arith.constant 0 : i32
    %c0_i32_0 = arith.constant 0 : i32
    %c0_i32_1 = arith.constant 0 : i32
    return %c0_i32, %c0_i32_0 : i32, i32
  }
  func.func @transform_2(%arg0: i32) -> (i32, i32) {
    %c0_i32 = arith.constant 0 : i32
    %c0_i32_0 = arith.constant 0 : i32
    %c0_i32_1 = arith.constant 0 : i32
    return %c0_i32, %c0_i32_0 : i32, i32
  }
  func.func @transform_3(%arg0: i32) -> (i32, i32) {
    %c0_i32 = arith.constant 0 : i32
    %c0_i32_0 = arith.constant 0 : i32
    return %arg0, %c0_i32 : i32, i32
  }
}

module attributes {stable_mosaic.version = 11 : i64} {
  func.func @_mm2_shift_relu_kernel(%arg0: i32, %arg1: memref<128x1152xbf16, #tpu.memory_space<vmem>>, %arg2: memref<1152x128xbf16, #tpu.memory_space<vmem>>, %arg3: memref<128x128xbf16, #tpu.memory_space<vmem>>, %arg4: memref<128x128xbf16, #tpu.memory_space<vmem>>, %arg5: memref<1x128xf32, #tpu.memory_space<vmem>>, %arg6: memref<128x128xf32, #tpu.memory_space<vmem>>) attributes {dimension_semantics = [#tpu.dimension_semantics<parallel>], iteration_bounds = array<i64: 1>, scalar_prefetch = 0 : i64, scratch_operands = 0 : i64, tpu.core_type = #tpu.core_type<tc>, window_params = [{transform_indices = @transform_0, window_bounds = array<i64: 128, 1152>}, {pipeline_mode = #tpu.pipeline_mode<synchronous>, transform_indices = @transform_1, window_bounds = array<i64: 1152, 128>}, {transform_indices = @transform_2, window_bounds = array<i64: 128, 128>}, {pipeline_mode = #tpu.pipeline_mode<synchronous>, transform_indices = @transform_3, window_bounds = array<i64: 128, 128>}, {pipeline_mode = #tpu.pipeline_mode<synchronous>, transform_indices = @transform_4, window_bounds = array<i64: 1, 128>}, {transform_indices = @transform_5, window_bounds = array<i64: 128, 128>}]} {
    %c0 = arith.constant 0 : index
    %c0_0 = arith.constant 0 : index
    %0 = vector.load %arg1[%c0, %c0_0] : memref<128x1152xbf16, #tpu.memory_space<vmem>>, vector<128x1152xbf16>
    %c0_1 = arith.constant 0 : index
    %c0_2 = arith.constant 0 : index
    %1 = vector.load %arg2[%c0_1, %c0_2] : memref<1152x128xbf16, #tpu.memory_space<vmem>>, vector<1152x128xbf16>
    %cst = arith.constant dense<0.000000e+00> : vector<128x128xf32>
    %2 = tpu.matmul %0, %1, %cst {dimension_numbers = #tpu.dot_dimension_numbers<[1], [0], [0], [1], [0, 0, 1, 1], [], []>} : vector<128x1152xbf16>, vector<1152x128xbf16>, vector<128x128xf32> -> vector<128x128xf32>
    %c0_3 = arith.constant 0 : index
    %c0_4 = arith.constant 0 : index
    %3 = vector.load %arg3[%c0_3, %c0_4] : memref<128x128xbf16, #tpu.memory_space<vmem>>, vector<128x128xbf16>
    %c0_5 = arith.constant 0 : index
    %c0_6 = arith.constant 0 : index
    %4 = vector.load %arg4[%c0_5, %c0_6] : memref<128x128xbf16, #tpu.memory_space<vmem>>, vector<128x128xbf16>
    %cst_7 = arith.constant dense<0.000000e+00> : vector<128x128xf32>
    %5 = tpu.matmul %3, %4, %cst_7 {dimension_numbers = #tpu.dot_dimension_numbers<[1], [0], [0], [1], [0, 0, 1, 1], [], []>} : vector<128x128xbf16>, vector<128x128xbf16>, vector<128x128xf32> -> vector<128x128xf32>
    %6 = arith.addf %2, %5 : vector<128x128xf32>
    %c0_8 = arith.constant 0 : index
    %c0_9 = arith.constant 0 : index
    %7 = vector.load %arg5[%c0_8, %c0_9] : memref<1x128xf32, #tpu.memory_space<vmem>>, vector<1x128xf32>
    %8 = vector.broadcast %7 : vector<1x128xf32> to vector<128x128xf32>
    %9 = arith.addf %6, %8 : vector<128x128xf32>
    %cst_10 = arith.constant 0.000000e+00 : f32
    %10 = vector.broadcast %cst_10 : f32 to vector<128x128xf32>
    %11 = arith.maximumf %9, %10 : vector<128x128xf32>
    %c0_11 = arith.constant 0 : index
    %c0_12 = arith.constant 0 : index
    %12 = vector.load %arg6[%c0_11, %c0_12] : memref<128x128xf32, #tpu.memory_space<vmem>>, vector<128x128xf32>
    tpu.vector_store %arg6[%c0_11, %c0_12], %11 {strides = array<i32>} : memref<128x128xf32, #tpu.memory_space<vmem>>, vector<128x128xf32>,
    return
  }
  func.func @transform_0(%arg0: i32) -> (i32, i32) {
    %c0_i32 = arith.constant 0 : i32
    %c0_i32_0 = arith.constant 0 : i32
    return %arg0, %c0_i32 : i32, i32
  }
  func.func @transform_1(%arg0: i32) -> (i32, i32) {
    %c0_i32 = arith.constant 0 : i32
    %c0_i32_0 = arith.constant 0 : i32
    %c0_i32_1 = arith.constant 0 : i32
    return %c0_i32, %c0_i32_0 : i32, i32
  }
  func.func @transform_2(%arg0: i32) -> (i32, i32) {
    %c0_i32 = arith.constant 0 : i32
    %c0_i32_0 = arith.constant 0 : i32
    return %arg0, %c0_i32 : i32, i32
  }
  func.func @transform_3(%arg0: i32) -> (i32, i32) {
    %c0_i32 = arith.constant 0 : i32
    %c0_i32_0 = arith.constant 0 : i32
    %c0_i32_1 = arith.constant 0 : i32
    return %c0_i32, %c0_i32_0 : i32, i32
  }
  func.func @transform_4(%arg0: i32) -> (i32, i32) {
    %c0_i32 = arith.constant 0 : i32
    %c0_i32_0 = arith.constant 0 : i32
    %c0_i32_1 = arith.constant 0 : i32
    return %c0_i32, %c0_i32_0 : i32, i32
  }
  func.func @transform_5(%arg0: i32) -> (i32, i32) {
    %c0_i32 = arith.constant 0 : i32
    %c0_i32_0 = arith.constant 0 : i32
    return %arg0, %c0_i32 : i32, i32
  }
}

</mosaic_0001>

<bundles_post_ra>
// kernel: basic_block_forward.2
= control target key start
LH: loop header
LB: loop body
LE: loop exit
PB: predicated region body
PF: predicated region fallthrough
CT: control target
= control target key end

     0   :  { %s618_s1 = inlined_call_operand.vmem [shape: bf16[128,128], index: 1, kind: input, shape index: {}]   ;;  %s619_s0 = inlined_call_operand.vmem [shape: bf16[128,128], index: 0, kind: input, shape index: {}]   ;;  %s620_s2 = inlined_call_operand.vmem [shape: f32[1,128], index: 2, kind: input, shape index: {}]   ;;  %s621_s3 = inlined_call_operand.vmem [shape: bf16[128,128], index: 3, kind: output, shape index: {}]  }
   0x1   :  { %v507_v0 = vld [vmem:[%s618_s1] sm:$0xff]   ;;  %v508_v1 = vld [vmem:[%s618_s1 + $0x8] sm:$0xff]   ;;  %v509_v2 = vld [vmem:[%s618_s1 + $0x10] sm:$0xff]  }
   0x2   :  { %459 = vmatprep.subr.bf16.mxu0 %v507_v0  ;;  %491 = vmatprep.subr.bf16.mxu1 %v507_v0  ;;  %v510_v3 = vld [vmem:[%s618_s1 + $0x18] sm:$0xff]   ;;  %v515_v4 = vld [vmem:[%s619_s0] sm:$0xff]   ;;  %v512_v7 = vld [vmem:[%s618_s1 + $0x28] sm:$0xff]  }
   0x3   :  { %460 = vmatpush3.bf16.msra.mxu0 %v507_v0  ;;  %499 = vmatpush3.bf16.msra.mxu1 %v507_v0  ;;  %v516_v5 = vld [vmem:[%s619_s0 + $0x20] sm:$0xff]   ;;  %v513_v8 = vld [vmem:[%s618_s1 + $0x30] sm:$0xff]   ;;  %v514_v9 = vld [vmem:[%s618_s1 + $0x38] sm:$0xff]  }
   0x4   :  { %461 = vmatprep.subr.bf16.mxu0 %v508_v1  ;;  %492 = vmatprep.subr.bf16.mxu1 %v508_v1  ;;  %v511_v6 = vld [vmem:[%s618_s1 + $0x20] sm:$0xff]   ;;  %v517_v10 = vld [vmem:[%s619_s0 + $0x8] sm:$0xff]   ;;  %v519_v12 = vld [vmem:[%s619_s0 + $0x10] sm:$0xff]  }
   0x5   :  { %475 = vmatprep.mubr.bf16.mxu0 %v515_v4  ;;  %483 = vmatprep.mubr.bf16.mxu1 %v516_v5  ;;  %v518_v11 = vld [vmem:[%s619_s0 + $0x28] sm:$0xff]   ;;  %v520_v13 = vld [vmem:[%s619_s0 + $0x30] sm:$0xff]   ;;  %v521_v14 = vld [vmem:[%s619_s0 + $0x18] sm:$0xff]  }
   0x6   :  { %v522_v15 = vld [vmem:[%s619_s0 + $0x38] sm:$0xff]   ;;  %v347_v16 = vld [vmem:[%s620_s2] ss:$0 sm:$0xff] }
   0x7   :  { %462 = vmatpush3.bf16.msra.mxu0 %v508_v1  ;;  %500 = vmatpush3.bf16.msra.mxu1 %v508_v1 }
   0x8   :  { %463 = vmatprep.subr.bf16.mxu0 %v509_v2  ;;  %493 = vmatprep.subr.bf16.mxu1 %v509_v2 }
   0xb   :  { %464 = vmatpush3.bf16.msra.mxu0 %v509_v2  ;;  %501 = vmatpush3.bf16.msra.mxu1 %v509_v2 }
   0xc   :  { %465 = vmatprep.subr.bf16.mxu0 %v510_v3  ;;  %494 = vmatprep.subr.bf16.mxu1 %v510_v3 }
   0xf   :  { %466 = vmatpush3.bf16.msra.mxu0 %v510_v3  ;;  %502 = vmatpush3.bf16.msra.mxu1 %v510_v3 }
  0x10   :  { %467 = vmatprep.subr.bf16.mxu0 %v511_v6  ;;  %495 = vmatprep.subr.bf16.mxu1 %v511_v6 }
  0x13   :  { %468 = vmatpush3.bf16.msra.mxu0 %v511_v6  ;;  %503 = vmatpush3.bf16.msra.mxu1 %v511_v6 }
  0x14   :  { %469 = vmatprep.subr.bf16.mxu0 %v512_v7  ;;  %496 = vmatprep.subr.bf16.mxu1 %v512_v7 }
  0x17   :  { %470 = vmatpush3.bf16.msra.mxu0 %v512_v7  ;;  %504 = vmatpush3.bf16.msra.mxu1 %v512_v7 }
  0x18   :  { %471 = vmatprep.subr.bf16.mxu0 %v513_v8  ;;  %497 = vmatprep.subr.bf16.mxu1 %v513_v8 }
  0x1b   :  { %472 = vmatpush3.bf16.msra.mxu0 %v513_v8  ;;  %505 = vmatpush3.bf16.msra.mxu1 %v513_v8 }
  0x1c   :  { %473 = vmatprep.subr.bf16.mxu0 %v514_v9  ;;  %498 = vmatprep.subr.bf16.mxu1 %v514_v9 }
  0x1f   :  { %474 = vmatpush3.bf16.msra.mxu0 %v514_v9  ;;  %506 = vmatpush3.bf16.msra.mxu1 %v514_v9 }
  0x22   :  { %476 = vmatmul.mubr.bf16.vlgmr.msra.gmra.mrb[0].mxu0 %v517_v10  ;;  %484 = vmatmul.mubr.bf16.vlgmr.msra.gmra.mrb[0].mxu1 %v518_v11 }
  0x23   :  { %479 = vmatprep.mubr.bf16.mxu0 %v519_v12  ;;  %487 = vmatprep.mubr.bf16.mxu1 %v520_v13 }
  0x2a   :  { %480 = vmatmul.mubr.bf16.gmra.mrb[4].mxu0 %v521_v14  ;;  %488 = vmatmul.mubr.bf16.gmra.mrb[4].mxu1 %v522_v15 }
  0xf5   :  { %v477_v17 = vpop.f32.mrb[0].mxu0  ;;  %v485_v18 = vpop.f32.mrb[0].mxu1 }
  0xf6   :  { %v193_v19 = vadd.f32 %v477_v17, %v347_v16  ;;  %v225_v20 = vadd.f32 %v485_v18, %v347_v16  ;;  %v184_v21 = vpop.f32.mrb[1].mxu0  ;;  %v216_v22 = vpop.f32.mrb[1].mxu1 }
  0xf7   :  { %v185_v23 = vadd.f32 %v347_v16, %v184_v21  ;;  %v217_v24 = vadd.f32 %v347_v16, %v216_v22  ;;  %v478_v25 = vpop.f32.mrb[2].mxu0  ;;  %v486_v26 = vpop.f32.mrb[2].mxu1 }
  0xf8   :  { %v196_v27 = vadd.f32 %v478_v25, %v347_v16  ;;  %v228_v28 = vadd.f32 %v486_v26, %v347_v16  ;;  %v187_v29 = vpop.f32.mrb[3].mxu0  ;;  %v219_v30 = vpop.f32.mrb[3].mxu1  ;;  %v249_v33 = vmax.f32 %v193_v19, 0.0  ;;  %v257_v34 = vmax.f32 %v225_v20, 0.0 }
  0xf9   :  { %v188_v31 = vadd.f32 %v347_v16, %v187_v29  ;;  %v220_v32 = vadd.f32 %v347_v16, %v219_v30  ;;  %v247_v37 = vmax.f32 %v185_v23, 0.0  ;;  %v255_v38 = vmax.f32 %v217_v24, 0.0 }
  0xfa   :  { %v250_v35 = vmax.f32 %v196_v27, 0.0  ;;  %v258_v36 = vmax.f32 %v228_v28, 0.0 }
  0xfb   :  { %v248_v39 = vmax.f32 %v188_v31, 0.0  ;;  %v256_v40 = vmax.f32 %v220_v32, 0.0 }
  0xfc   :  { %v404_v41 = vpack.c.bf16 %v250_v35, %v249_v33  ;;  %v424_v42 = vpack.c.bf16 %v258_v36, %v257_v34 }
  0xfd   :  { %v399_v43 = vpack.c.bf16 %v248_v39, %v247_v37  ;;  %v419_v44 = vpack.c.bf16 %v256_v40, %v255_v38  ;;  %v481_v45 = vpop.f32.mrb[4].mxu0  ;;  %v489_v46 = vpop.f32.mrb[4].mxu1 }
  0xfe   :  { %436 = vst [vmem:[%s621_s3 + $0x8] sm:$0xff] %v404_v41   ;;  %440 = vst [vmem:[%s621_s3 + $0x28] sm:$0xff] %v424_v42   ;;  %v209_v47 = vadd.f32 %v481_v45, %v347_v16  ;;  %v241_v48 = vadd.f32 %v489_v46, %v347_v16  ;;  %v200_v49 = vpop.f32.mrb[5].mxu0  ;;  %v232_v50 = vpop.f32.mrb[5].mxu1 }
  0xff   :  { %400 = vst [vmem:[%s621_s3] sm:$0xff] %v399_v43   ;;  %439 = vst [vmem:[%s621_s3 + $0x20] sm:$0xff] %v419_v44   ;;  %v201_v51 = vadd.f32 %v347_v16, %v200_v49  ;;  %v233_v52 = vadd.f32 %v347_v16, %v232_v50  ;;  %v482_v53 = vpop.f32.mrb[6].mxu0  ;;  %v490_v54 = vpop.f32.mrb[6].mxu1 }
 0x100   :  { %v212_v55 = vadd.f32 %v482_v53, %v347_v16  ;;  %v244_v56 = vadd.f32 %v490_v54, %v347_v16  ;;  %v203_v57 = vpop.f32.mrb[7].mxu0  ;;  %v235_v58 = vpop.f32.mrb[7].mxu1  ;;  %v253_v61 = vmax.f32 %v209_v47, 0.0  ;;  %v261_v62 = vmax.f32 %v241_v48, 0.0 }
 0x101   :  { %v204_v59 = vadd.f32 %v347_v16, %v203_v57  ;;  %v236_v60 = vadd.f32 %v347_v16, %v235_v58  ;;  %v251_v1 = vmax.f32 %v201_v51, 0.0  ;;  %v259_v2 = vmax.f32 %v233_v52, 0.0 }
 0x102   :  { %v254_v63 = vmax.f32 %v212_v55, 0.0  ;;  %v262_v0 = vmax.f32 %v244_v56, 0.0 }
 0x103   :  { %v252_v3 = vmax.f32 %v204_v59, 0.0  ;;  %v260_v4 = vmax.f32 %v236_v60, 0.0 }
 0x104   :  { %v414_v5 = vpack.c.bf16 %v254_v63, %v253_v61  ;;  %v434_v6 = vpack.c.bf16 %v262_v0, %v261_v62 }
 0x105   :  { %v409_v7 = vpack.c.bf16 %v252_v3, %v251_v1  ;;  %v429_v8 = vpack.c.bf16 %v260_v4, %v259_v2 }
 0x106   :  { %438 = vst [vmem:[%s621_s3 + $0x18] sm:$0xff] %v414_v5   ;;  %442 = vst [vmem:[%s621_s3 + $0x38] sm:$0xff] %v434_v6  }
 0x107   :  { %437 = vst [vmem:[%s621_s3 + $0x10] sm:$0xff] %v409_v7   ;;  %441 = vst [vmem:[%s621_s3 + $0x30] sm:$0xff] %v429_v8  }

// kernel: basic_block_forward.3
= control target key start
LH: loop header
LB: loop body
LE: loop exit
PB: predicated region body
PF: predicated region fallthrough
CT: control target
= control target key end

     0   :  { %s3352_s3 = inlined_call_operand.vmem [shape: bf16[128,128], index: 3, kind: input, shape index: {}]   ;;  %s3353_s1 = inlined_call_operand.vmem [shape: bf16[1152,128], index: 1, kind: input, shape index: {}]   ;;  %s3354_s2 = inlined_call_operand.vmem [shape: bf16[128,128], index: 2, kind: input, shape index: {}]   ;;  %s3355_s0 = inlined_call_operand.vmem [shape: bf16[128,1152], index: 0, kind: input, shape index: {}]   ;;  %s3356_s4 = inlined_call_operand.vmem [shape: f32[1,128], index: 4, kind: input, shape index: {}]   ;;  %s3357_s5 = inlined_call_operand.vmem [shape: f32[128,128], index: 5, kind: output, shape index: {}]  }
   0x1   :  { %v2407_v0 = vld [vmem:[%s3352_s3] sm:$0xff]   ;;  %v2410_v3 = vld [vmem:[%s3352_s3 + $0x8] sm:$0xff]   ;;  %v2413_v6 = vld [vmem:[%s3352_s3 + $0x10] sm:$0xff]  }
   0x2   :  { %v2408_v1 = vld [vmem:[%s3353_s1 + $0xc0] sm:$0xff]   ;;  %2263 = vmatprep.subr.bf16.mxu1 %v2407_v0  ;;  %v2411_v4 = vld [vmem:[%s3353_s1 + $0xc8] sm:$0xff]   ;;  %v2414_v7 = vld [vmem:[%s3353_s1 + $0xd0] sm:$0xff]  }
   0x3   :  { %v2409_v2 = vld [vmem:[%s3353_s1 + $0x80] sm:$0xff]   ;;  %2055 = vmatprep.subr.bf16.mxu0 %v2408_v1  ;;  %2264 = vmatpush3.bf16.msra.mxu1 %v2407_v0  ;;  %v2412_v5 = vld [vmem:[%s3353_s1 + $0x88] sm:$0xff]   ;;  %v2415_v8 = vld [vmem:[%s3353_s1 + $0x90] sm:$0xff]  }
   0x4   :  { %2056 = vmatpush3.bf16.msra.mxu0 %v2409_v2  ;;  %2265 = vmatprep.subr.bf16.mxu1 %v2410_v3  ;;  %v2416_v9 = vld [vmem:[%s3352_s3 + $0x18] sm:$0xff]   ;;  %v2419_v12 = vld [vmem:[%s3352_s3 + $0x20] sm:$0xff]   ;;  %v2422_v15 = vld [vmem:[%s3352_s3 + $0x28] sm:$0xff]  }
   0x5   :  { %2057 = vmatprep.subr.bf16.mxu0 %v2411_v4  ;;  %v2417_v10 = vld [vmem:[%s3353_s1 + $0xd8] sm:$0xff]   ;;  %v2420_v13 = vld [vmem:[%s3353_s1 + $0xe0] sm:$0xff]   ;;  %v2423_v16 = vld [vmem:[%s3353_s1 + $0xe8] sm:$0xff]  }
   0x6   :  { %v2418_v11 = vld [vmem:[%s3353_s1 + $0x98] sm:$0xff]   ;;  %v2421_v14 = vld [vmem:[%s3353_s1 + $0xa0] sm:$0xff]   ;;  %v2424_v17 = vld [vmem:[%s3353_s1 + $0xa8] sm:$0xff]  }
   0x7   :  { %2266 = vmatpush3.bf16.msra.mxu1 %v2410_v3  ;;  %v2425_v18 = vld [vmem:[%s3352_s3 + $0x30] sm:$0xff]   ;;  %v2428_v21 = vld [vmem:[%s3352_s3 + $0x38] sm:$0xff]   ;;  %v2431_v22 = vld [vmem:[%s3354_s2] sm:$0xff]  }
   0x8   :  { %2058 = vmatpush3.bf16.msra.mxu0 %v2412_v5  ;;  %2267 = vmatprep.subr.bf16.mxu1 %v2413_v6  ;;  %v2426_v19 = vld [vmem:[%s3353_s1 + $0xf0] sm:$0xff]   ;;  %v2429_v23 = vld [vmem:[%s3353_s1 + $0xf8] sm:$0xff]   ;;  %v2436_v26 = vld [vmem:[%s3353_s1 + $0x40] sm:$0xff]  }
   0x9   :  { %2059 = vmatprep.subr.bf16.mxu0 %v2414_v7  ;;  %v2427_v20 = vld [vmem:[%s3353_s1 + $0xb0] sm:$0xff]   ;;  %2279 = vmatprep.mubr.bf16.mxu1 %v2431_v22  ;;  %v2430_v25 = vld [vmem:[%s3353_s1 + $0xb8] sm:$0xff]   ;;  %v2432_v27 = vld [vmem:[%s3355_s0 + $0x8] ss:$36 sps:$4 sm:$0xff]  }
   0xa   :  { %v2434_v24 = vld [vmem:[%s3355_s0 + $0xc] ss:$36 sps:$4 sm:$0xff]   ;;  %v2437_v29 = vld [vmem:[%s3353_s1] sm:$0xff]   ;;  %v2442_v34 = vld [vmem:[%s3355_s0 + $0x54] ss:$36 sps:$4 sm:$0xff]  }
   0xb   :  { %2268 = vmatpush3.bf16.msra.mxu1 %v2413_v6  ;;  %1399 = vmatprep.mubr.bf16.mxu0 %v2434_v24  ;;  %v2435_v28 = vld [vmem:[%s3354_s2 + $0x8] sm:$0xff]   ;;  %v2440_v31 = vld [vmem:[%s3353_s1 + $0x1c0] sm:$0xff]   ;;  %v2441_v33 = vld [vmem:[%s3354_s2 + $0x10] sm:$0xff]  }
   0xc   :  { %2060 = vmatpush3.bf16.msra.mxu0 %v2415_v8  ;;  %2269 = vmatprep.subr.bf16.mxu1 %v2416_v9  ;;  %v2438_v30 = vld [vmem:[%s3353_s1 + $0x48] sm:$0xff]   ;;  %v2444_v35 = vld [vmem:[%s3353_s1 + $0x180] sm:$0xff]   ;;  %v2445_v36 = vld [vmem:[%s3354_s2 + $0x18] sm:$0xff]  }
   0xd   :  { %2061 = vmatprep.subr.bf16.mxu0 %v2417_v10  ;;  %v2439_v32 = vld [vmem:[%s3353_s1 + $0x8] sm:$0xff]   ;;  %v2446_v37 = vld [vmem:[%s3353_s1 + $0x50] sm:$0xff]   ;;  %v2449_v40 = vld [vmem:[%s3353_s1 + $0x58] sm:$0xff]  }
   0xe   :  { %v2447_v38 = vld [vmem:[%s3355_s0 + $0x50] ss:$36 sps:$4 sm:$0xff]   ;;  %v2450_v41 = vld [vmem:[%s3353_s1 + $0x18] sm:$0xff]   ;;  %v2451_v42 = vld [vmem:[%s3353_s1 + $0x1c8] sm:$0xff]  }
   0xf   :  { %2270 = vmatpush3.bf16.msra.mxu1 %v2416_v9  ;;  %v2448_v39 = vld [vmem:[%s3353_s1 + $0x10] sm:$0xff]   ;;  %v2452_v43 = vld [vmem:[%s3354_s2 + $0x20] sm:$0xff]   ;;  %v2455_v45 = vld [vmem:[%s3353_s1 + $0x188] sm:$0xff]  }
  0x10   :  { %2062 = vmatpush3.bf16.msra.mxu0 %v2418_v11  ;;  %2271 = vmatprep.subr.bf16.mxu1 %v2419_v12  ;;  %v2453_v44 = vld [vmem:[%s3355_s0 + $0x9c] ss:$36 sps:$4 sm:$0xff]   ;;  %v2456_v46 = vld [vmem:[%s3354_s2 + $0x28] sm:$0xff]   ;;  %v2462_v52 = vld [vmem:[%s3353_s1 + $0x1d0] sm:$0xff]  }
  0x11   :  { %2063 = vmatprep.subr.bf16.mxu0 %v2420_v13  ;;  %v2457_v47 = vld [vmem:[%s3353_s1 + $0x60] sm:$0xff]   ;;  %v2458_v48 = vld [vmem:[%s3355_s0 + $0x98] ss:$36 sps:$4 sm:$0xff]   ;;  %v2460_v50 = vld [vmem:[%s3353_s1 + $0x68] sm:$0xff]  }
  0x12   :  { %v2459_v49 = vld [vmem:[%s3353_s1 + $0x20] sm:$0xff]   ;;  %v2461_v51 = vld [vmem:[%s3353_s1 + $0x28] sm:$0xff]   ;;  %v2463_v53 = vld [vmem:[%s3354_s2 + $0x30] sm:$0xff]  }
  0x13   :  { %2272 = vmatpush3.bf16.msra.mxu1 %v2419_v12  ;;  %v2464_v54 = vld [vmem:[%s3355_s0 + $0xe4] ss:$36 sps:$4 sm:$0xff]   ;;  %v2466_v55 = vld [vmem:[%s3353_s1 + $0x190] sm:$0xff]   ;;  %v2467_v56 = vld [vmem:[%s3354_s2 + $0x38] sm:$0xff]  }
  0x14   :  { %2064 = vmatpush3.bf16.msra.mxu0 %v2421_v14  ;;  %2273 = vmatprep.subr.bf16.mxu1 %v2422_v15  ;;  %v2468_v57 = vld [vmem:[%s3353_s1 + $0x70] sm:$0xff]   ;;  %v2469_v58 = vld [vmem:[%s3355_s0 + $0xe0] ss:$36 sps:$4 sm:$0xff]   ;;  %v2471_v60 = vld [vmem:[%s3353_s1 + $0x78] sm:$0xff]  }
  0x15   :  { %2065 = vmatprep.subr.bf16.mxu0 %v2423_v16  ;;  %v2470_v59 = vld [vmem:[%s3353_s1 + $0x30] sm:$0xff]   ;;  %v2472_v61 = vld [vmem:[%s3353_s1 + $0x38] sm:$0xff]   ;;  %v2474_v63 = vld [vmem:[%s3355_s0] ss:$36 sps:$4 sm:$0xff]  }
  0x16   :  { %v2473_v62 = vld [vmem:[%s3353_s1 + $0x1d8] sm:$0xff]   ;;  %v2476_v0 = vld [vmem:[%s3355_s0 + $0x4] ss:$36 sps:$4 sm:$0xff]   ;;  %v2477_v1 = vld [vmem:[%s3355_s0 + $0x12c] ss:$36 sps:$4 sm:$0xff]  }
  0x17   :  { %2274 = vmatpush3.bf16.msra.mxu1 %v2422_v15  ;;  %v2479_v2 = vld [vmem:[%s3353_s1 + $0x198] sm:$0xff]   ;;  %v2480_v3 = vld [vmem:[%s3355_s0 + $0x128] ss:$36 sps:$4 sm:$0xff]   ;;  %v2481_v4 = vld [vmem:[%s3353_s1 + $0x140] sm:$0xff]  }
  0x18   :  { %2066 = vmatpush3.bf16.msra.mxu0 %v2424_v17  ;;  %2275 = vmatprep.subr.bf16.mxu1 %v2425_v18  ;;  %v2482_v5 = vld [vmem:[%s3353_s1 + $0x100] sm:$0xff]   ;;  %v2484_v7 = vld [vmem:[%s3355_s0 + $0x4c] ss:$36 sps:$4 sm:$0xff]   ;;  %v2486_v8 = vld [vmem:[%s3355_s0 + $0x174] ss:$36 sps:$4 sm:$0xff]  }
  0x19   :  { %2067 = vmatprep.subr.bf16.mxu0 %v2426_v19  ;;  %v2483_v6 = vld [vmem:[%s3353_s1 + $0x1e0] sm:$0xff]   ;;  %v2489_v10 = vld [vmem:[%s3355_s0 + $0x48] ss:$36 sps:$4 sm:$0xff]   ;;  %v2490_v11 = vld [vmem:[%s3355_s0 + $0x170] ss:$36 sps:$4 sm:$0xff]  }
  0x1a   :  { %v2488_v9 = vld [vmem:[%s3353_s1 + $0x1a0] sm:$0xff]   ;;  %v2491_v12 = vld [vmem:[%s3353_s1 + $0x148] sm:$0xff]   ;;  %v2494_v15 = vld [vmem:[%s3355_s0 + $0x94] ss:$36 sps:$4 sm:$0xff]  }
  0x1b   :  { %2276 = vmatpush3.bf16.msra.mxu1 %v2425_v18  ;;  %v2492_v13 = vld [vmem:[%s3353_s1 + $0x108] sm:$0xff]   ;;  %v2496_v16 = vld [vmem:[%s3355_s0 + $0x1bc] ss:$36 sps:$4 sm:$0xff]   ;;  %v2499_v18 = vld [vmem:[%s3355_s0 + $0x90] ss:$36 sps:$4 sm:$0xff]  }
  0x1c   :  { %2068 = vmatpush3.bf16.msra.mxu0 %v2427_v20  ;;  %2277 = vmatprep.subr.bf16.mxu1 %v2428_v21  ;;  %v2493_v14 = vld [vmem:[%s3353_s1 + $0x1e8] sm:$0xff]   ;;  %v2500_v19 = vld [vmem:[%s3355_s0 + $0x1b8] ss:$36 sps:$4 sm:$0xff]   ;;  %v2501_v20 = vld [vmem:[%s3353_s1 + $0x150] sm:$0xff]  }
  0x1d   :  { %2069 = vmatprep.subr.bf16.mxu0 %v2429_v23  ;;  %v2498_v17 = vld [vmem:[%s3353_s1 + $0x1a8] sm:$0xff]   ;;  %v2503_v22 = vld [vmem:[%s3353_s1 + $0x1f0] sm:$0xff]   ;;  %v2504_v23 = vld [vmem:[%s3355_s0 + $0xdc] ss:$36 sps:$4 sm:$0xff]  }
  0x1e   :  { %v2506_v24 = vld [vmem:[%s3355_s0 + $0x204] ss:$36 sps:$4 sm:$0xff]  }
  0x1f   :  { %2278 = vmatpush3.bf16.msra.mxu1 %v2428_v21  ;;  %v2502_v21 = vld [vmem:[%s3353_s1 + $0x110] sm:$0xff]  }
  0x20   :  { %2070 = vmatpush3.bf16.msra.mxu0 %v2430_v25  ;;  %1991 = vmatprep.subr.bf16.mxu1 %v2436_v26  ;;  %v2508_v25 = vld [vmem:[%s3353_s1 + $0x1b0] sm:$0xff]   ;;  %v2509_v26 = vld [vmem:[%s3355_s0 + $0xd8] ss:$36 sps:$4 sm:$0xff]  }
  0x21   :  { %2183 = vmatprep.subr.bf16.mxu0 %v2440_v31  ;;  %v2514_v31 = vld [vmem:[%s3353_s1 + $0x1b8] sm:$0xff]  }
  0x22   :  { %2280 = vmatmul.mubr.bf16.vlgmr.msra.gmra.mrb[0].mxu1 %v2435_v28  ;;  %v2510_v28 = vld [vmem:[%s3355_s0 + $0x200] ss:$36 sps:$4 sm:$0xff]  }
  0x23   :  { %1400 = vmatmul.mubr.bf16.vlgmr.msra.gmra.mrb[0].mxu0 %v2432_v27  ;;  %1992 = vmatpush3.bf16.msra.mxu1 %v2437_v29  ;;  %v2511_v27 = vld [vmem:[%s3353_s1 + $0x158] sm:$0xff]  }
  0x24   :  { %1993 = vmatprep.subr.bf16.mxu1 %v2438_v30  ;;  %2283 = vmatprep.mubr.bf16.mxu1 %v2441_v33  ;;  %v2512_v29 = vld [vmem:[%s3353_s1 + $0x118] sm:$0xff]  }
  0x25   :  { %1407 = vmatprep.mubr.bf16.mxu0 %v2442_v34  ;;  %2184 = vmatpush3.bf16.msra.mxu0 %v2444_v35  ;;  %v2513_v30 = vld [vmem:[%s3353_s1 + $0x1f8] sm:$0xff]   ;;  %v2521_v34 = vld [vmem:[%s3353_s1 + $0x160] sm:$0xff]  }
  0x26   :  { %2185 = vmatprep.subr.bf16.mxu0 %v2451_v42  ;;  %v2519_v33 = vld [vmem:[%s3355_s0 + $0x1c] ss:$36 sps:$4 sm:$0xff]   ;;  %v2531_v42 = vld [vmem:[%s3353_s1 + $0x128] sm:$0xff]  }
  0x27   :  { %1994 = vmatpush3.bf16.msra.mxu1 %v2439_v32  ;;  %v2515_v32 = vld [vmem:[%s3355_s0 + $0x124] ss:$36 sps:$4 sm:$0xff]  }
  0x28   :  { %1995 = vmatprep.subr.bf16.mxu1 %v2446_v37  ;;  %v2522_v35 = vld [vmem:[%s3353_s1 + $0x120] sm:$0xff]  }
  0x29   :  { %2186 = vmatpush3.bf16.msra.mxu0 %v2455_v45  ;;  %v2523_v37 = vld [vmem:[%s3353_s1 + $0x200] sm:$0xff]  }
  0x2a   :  { %2284 = vmatmul.mubr.bf16.gmra.mrb[4].mxu1 %v2445_v36  ;;  %2187 = vmatprep.subr.bf16.mxu0 %v2462_v52  ;;  %v2517_v36 = vld [vmem:[%s3355_s0 + $0x18] ss:$36 sps:$4 sm:$0xff]   ;;  %v2530_v45 = vld [vmem:[%s3355_s0 + $0x60] ss:$36 sps:$4 sm:$0xff]  }
  0x2b   :  { %1408 = vmatmul.mubr.bf16.gmra.mrb[4].mxu0 %v2447_v38  ;;  %1996 = vmatpush3.bf16.msra.mxu1 %v2448_v39  ;;  %v2520_v38 = vld [vmem:[%s3355_s0 + $0x120] ss:$36 sps:$4 sm:$0xff]   ;;  %v2524_v39 = vld [vmem:[%s3355_s0 + $0x16c] ss:$36 sps:$4 sm:$0xff]   ;;  %v2547_v52 = vld [vmem:[%s3353_s1 + $0x178] sm:$0xff]  }
  0x2c   :  { %1997 = vmatprep.subr.bf16.mxu1 %v2449_v40  ;;  %2287 = vmatprep.mubr.bf16.mxu1 %v2452_v43  ;;  %v2526_v40 = vld [vmem:[%s3355_s0 + $0x64] ss:$36 sps:$4 sm:$0xff]  }
  0x2d   :  { %1415 = vmatprep.mubr.bf16.mxu0 %v2453_v44  ;;  %2188 = vmatpush3.bf16.msra.mxu0 %v2466_v55  ;;  %v2532_v43 = vld [vmem:[%s3353_s1 + $0x208] sm:$0xff]  }
  0x2e   :  { %2189 = vmatprep.subr.bf16.mxu0 %v2473_v62  ;;  %v2528_v44 = vld [vmem:[%s3355_s0 + $0x168] ss:$36 sps:$4 sm:$0xff]   ;;  %v2553_v62 = vld [vmem:[%s3355_s0 + $0x14] ss:$36 sps:$4 sm:$0xff]  }
  0x2f   :  { %1998 = vmatpush3.bf16.msra.mxu1 %v2450_v41  ;;  %v2529_v41 = vld [vmem:[%s3353_s1 + $0x168] sm:$0xff]  }
  0x30   :  { %1999 = vmatprep.subr.bf16.mxu1 %v2457_v47  ;;  %v2535_v47 = vld [vmem:[%s3355_s0 + $0xac] ss:$36 sps:$4 sm:$0xff]  }
  0x31   :  { %2190 = vmatpush3.bf16.msra.mxu0 %v2479_v2  ;;  %v2539_v55 = vld [vmem:[%s3355_s0 + $0xa8] ss:$36 sps:$4 sm:$0xff]   ;;  %v2551_v2 = vld [vmem:[%s3355_s0 + $0x10] ss:$36 sps:$4 sm:$0xff]  }
  0x32   :  { %2288 = vmatmul.mubr.bf16.gmra.mrb[8].mxu1 %v2456_v46  ;;  %2191 = vmatprep.subr.bf16.mxu0 %v2483_v6  ;;  %v2533_v46 = vld [vmem:[%s3355_s0 + $0x1b4] ss:$36 sps:$4 sm:$0xff]  }
  0x33   :  { %1416 = vmatmul.mubr.bf16.gmra.mrb[8].mxu0 %v2458_v48  ;;  %2000 = vmatpush3.bf16.msra.mxu1 %v2459_v49  ;;  %v2538_v48 = vld [vmem:[%s3353_s1 + $0x170] sm:$0xff]   ;;  %v2562_v6 = vld [vmem:[%s3355_s0 + $0x58] ss:$36 sps:$4 sm:$0xff]  }
  0x34   :  { %2001 = vmatprep.subr.bf16.mxu1 %v2460_v50  ;;  %2291 = vmatprep.mubr.bf16.mxu1 %v2463_v53  ;;  %v2540_v49 = vld [vmem:[%s3353_s1 + $0x130] sm:$0xff]   ;;  %v2549_v53 = vld [vmem:[%s3353_s1 + $0x138] sm:$0xff]  }
  0x35   :  { %1423 = vmatprep.mubr.bf16.mxu0 %v2464_v54  ;;  %2192 = vmatpush3.bf16.msra.mxu0 %v2488_v9  ;;  %v2541_v50 = vld [vmem:[%s3353_s1 + $0x210] sm:$0xff]   ;;  %v2550_v54 = vld [vmem:[%s3353_s1 + $0x218] sm:$0xff]  }
  0x36   :  { %2193 = vmatprep.subr.bf16.mxu0 %v2493_v14  ;;  %v2567_v9 = vld [vmem:[%s3355_s0 + $0x1cc] ss:$36 sps:$4 sm:$0xff]  }
  0x37   :  { %2002 = vmatpush3.bf16.msra.mxu1 %v2461_v51  ;;  %v2537_v51 = vld [vmem:[%s3355_s0 + $0x1b0] ss:$36 sps:$4 sm:$0xff]   ;;  %v2576_v14 = vld [vmem:[%s3355_s0 + $0xe8] ss:$36 sps:$4 sm:$0xff]  }
  0x38   :  { %2003 = vmatprep.subr.bf16.mxu1 %v2468_v57  ;;  %v2544_v57 = vld [vmem:[%s3355_s0 + $0xf4] ss:$36 sps:$4 sm:$0xff]  }
  0x39   :  { %2194 = vmatpush3.bf16.msra.mxu0 %v2498_v17  ;;  %v2581_v17 = vld [vmem:[%s3355_s0 + $0x20] ss:$36 sps:$4 sm:$0xff]  }
  0x3a   :  { %2292 = vmatmul.mubr.bf16.gmra.mrb[12].mxu1 %v2467_v56  ;;  %2195 = vmatprep.subr.bf16.mxu0 %v2503_v22  ;;  %v2542_v56 = vld [vmem:[%s3355_s0 + $0x1fc] ss:$36 sps:$4 sm:$0xff]  }
  0x3b   :  { %1424 = vmatmul.mubr.bf16.gmra.mrb[12].mxu0 %v2469_v58  ;;  %2004 = vmatpush3.bf16.msra.mxu1 %v2470_v59  ;;  %v2557_v58 = vld [vmem:[%s3353_s1 + $0x220] sm:$0xff]   ;;  %v2546_v59 = vld [vmem:[%s3355_s0 + $0x1f8] ss:$36 sps:$4 sm:$0xff]  }
  0x3c   :  { %2005 = vmatprep.subr.bf16.mxu1 %v2471_v60  ;;  %1302 = vmatprep.mubr.bf16.mxu1 %v2476_v0  ;;  %v2564_v60 = vld [vmem:[%s3353_s1 + $0x228] sm:$0xff]   ;;  %v2571_v0 = vld [vmem:[%s3353_s1 + $0x230] sm:$0xff]   ;;  %v2587_v22 = vld [vmem:[%s3355_s0 + $0x178] ss:$36 sps:$4 sm:$0xff]  }
  0x3d   :  { %1431 = vmatprep.mubr.bf16.mxu0 %v2477_v1  ;;  %2196 = vmatpush3.bf16.msra.mxu0 %v2508_v25  ;;  %v2578_v1 = vld [vmem:[%s3353_s1 + $0x238] sm:$0xff]   ;;  %v2591_v25 = vld [vmem:[%s3355_s0 + $0x140] ss:$36 sps:$4 sm:$0xff]  }
  0x3e   :  { %2197 = vmatprep.subr.bf16.mxu0 %v2513_v30  ;;  %v2597_v30 = vld [vmem:[%s3355_s0 + $0x208] ss:$36 sps:$4 sm:$0xff]  }
  0x3f   :  { %2006 = vmatpush3.bf16.msra.mxu1 %v2472_v61  ;;  %v2548_v61 = vld [vmem:[%s3355_s0 + $0xf0] ss:$36 sps:$4 sm:$0xff]  }
  0x40   :  { %2119 = vmatprep.subr.bf16.mxu1 %v2481_v4  ;;  %v2558_v4 = vld [vmem:[%s3355_s0 + $0x5c] ss:$36 sps:$4 sm:$0xff]  }
  0x41   :  { %2198 = vmatpush3.bf16.msra.mxu0 %v2514_v31  ;;  %v2598_v31 = vld [vmem:[%s3355_s0 + $0x218] ss:$36 sps:$4 sm:$0xff]  }
  0x42   :  { %1303 = vmatmul.mubr.bf16.vlgmr.msra.gmra.mrb[16].mxu1 %v2474_v63  ;;  %2295 = vmatprep.subr.bf16.mxu0 %v2523_v37  ;;  %v2554_v63 = vld [vmem:[%s3355_s0 + $0x13c] ss:$36 sps:$4 sm:$0xff]  }
  0x43   :  { %1432 = vmatmul.mubr.bf16.gmra.mrb[16].mxu0 %v2480_v3  ;;  %2120 = vmatpush3.bf16.msra.mxu1 %v2482_v5  ;;  %v2556_v3 = vld [vmem:[%s3355_s0 + $0x138] ss:$36 sps:$4 sm:$0xff]   ;;  %v2560_v5 = vld [vmem:[%s3355_s0 + $0x184] ss:$36 sps:$4 sm:$0xff]  }
  0x44   :  { %1310 = vmatprep.mubr.bf16.mxu1 %v2484_v7  ;;  %1439 = vmatprep.mubr.bf16.mxu0 %v2486_v8  ;;  %v2563_v7 = vld [vmem:[%s3355_s0 + $0x180] ss:$36 sps:$4 sm:$0xff]  }
  0x45   :  { %2121 = vmatprep.subr.bf16.mxu1 %v2491_v12  ;;  %v2565_v8 = vld [vmem:[%s3355_s0 + $0xa4] ss:$36 sps:$4 sm:$0xff]   ;;  %v2572_v12 = vld [vmem:[%s3355_s0 + $0xec] ss:$36 sps:$4 sm:$0xff]  }
  0x47   :  { %2122 = vmatpush3.bf16.msra.mxu1 %v2492_v13  ;;  %v2574_v13 = vld [vmem:[%s3355_s0 + $0x214] ss:$36 sps:$4 sm:$0xff]  }
  0x48   :  { %2123 = vmatprep.subr.bf16.mxu1 %v2501_v20  ;;  %v2584_v20 = vld [vmem:[%s3355_s0 + $0x17c] ss:$36 sps:$4 sm:$0xff]  }
  0x4a   :  { %1311 = vmatmul.mubr.bf16.gmra.mrb[20].mxu1 %v2489_v10  ;;  %v2569_v10 = vld [vmem:[%s3355_s0 + $0xa0] ss:$36 sps:$4 sm:$0xff]  }
  0x4b   :  { %1440 = vmatmul.mubr.bf16.gmra.mrb[20].mxu0 %v2490_v11  ;;  %1318 = vmatprep.mubr.bf16.mxu1 %v2494_v15  ;;  %v2570_v11 = vld [vmem:[%s3355_s0 + $0x1c8] ss:$36 sps:$4 sm:$0xff]   ;;  %v2577_v15 = vld [vmem:[%s3355_s0 + $0x210] ss:$36 sps:$4 sm:$0xff]  }
  0x4c   :  { %1447 = vmatprep.mubr.bf16.mxu0 %v2496_v16  ;;  %2124 = vmatpush3.bf16.msra.mxu1 %v2502_v21  ;;  %v2579_v16 = vld [vmem:[%s3355_s0 + $0x134] ss:$36 sps:$4 sm:$0xff]  }
  0x4d   :  { %2125 = vmatprep.subr.bf16.mxu1 %v2511_v27  ;;  %v2586_v21 = vld [vmem:[%s3355_s0 + $0xb0] ss:$36 sps:$4 sm:$0xff]   ;;  %v2593_v27 = vld [vmem:[%s3355_s0 + $0x188] ss:$36 sps:$4 sm:$0xff]  }
  0x50   :  { %2126 = vmatpush3.bf16.msra.mxu1 %v2512_v29  ;;  %v2596_v29 = vld [vmem:[%s3355_s0 + $0x1d0] ss:$36 sps:$4 sm:$0xff]  }
  0x51   :  { %2127 = vmatprep.subr.bf16.mxu1 %v2521_v34 }
  0x52   :  { %1319 = vmatmul.mubr.bf16.gmra.mrb[24].mxu1 %v2499_v18  ;;  %v2582_v18 = vld [vmem:[%s3355_s0 + $0x130] ss:$36 sps:$4 sm:$0xff]  }
  0x53   :  { %1448 = vmatmul.mubr.bf16.gmra.mrb[24].mxu0 %v2500_v19  ;;  %1326 = vmatprep.mubr.bf16.mxu1 %v2504_v23  ;;  %v2583_v19 = vld [vmem:[%s3355_s0 + $0x68] ss:$36 sps:$4 sm:$0xff]   ;;  %v2588_v23 = vld [vmem:[%s3355_s0 + $0xf8] ss:$36 sps:$4 sm:$0xff]  }
  0x54   :  { %1455 = vmatprep.mubr.bf16.mxu0 %v2506_v24  ;;  %2128 = vmatpush3.bf16.msra.mxu1 %v2522_v35  ;;  %v2589_v24 = vld [vmem:[%s3355_s0 + $0x1c4] ss:$36 sps:$4 sm:$0xff]  }
  0x55   :  { %2129 = vmatprep.subr.bf16.mxu1 %v2529_v41 }
  0x58   :  { %2130 = vmatpush3.bf16.msra.mxu1 %v2531_v42 }
  0x59   :  { %2131 = vmatprep.subr.bf16.mxu1 %v2538_v48 }
  0x5a   :  { %1327 = vmatmul.mubr.bf16.gmra.mrb[28].mxu1 %v2509_v26  ;;  %v2592_v26 = vld [vmem:[%s3355_s0 + $0x1c0] ss:$36 sps:$4 sm:$0xff]  }
  0x5b   :  { %1456 = vmatmul.mubr.bf16.gmra.mrb[28].mxu0 %v2510_v28  ;;  %1334 = vmatprep.mubr.bf16.mxu1 %v2515_v32  ;;  %v2594_v28 = vld [vmem:[%s3355_s0 + $0x20c] ss:$36 sps:$4 sm:$0xff]  }
  0x5c   :  { %1593 = vmatprep.mubr.bf16.mxu0 %v2519_v33  ;;  %2132 = vmatpush3.bf16.msra.mxu1 %v2540_v49 }
  0x5d   :  { %2133 = vmatprep.subr.bf16.mxu1 %v2547_v52 }
  0x60   :  { %2134 = vmatpush3.bf16.msra.mxu1 %v2549_v53 }
  0x62   :  { %1335 = vmatmul.mubr.bf16.gmra.mrb[32].mxu1 %v2520_v38 }
  0x63   :  { %1594 = vmatmul.mubr.bf16.vlgmr.msra.gmra.mrb[32].mxu0 %v2517_v36  ;;  %1342 = vmatprep.mubr.bf16.mxu1 %v2524_v39 }
  0x64   :  { %1601 = vmatprep.mubr.bf16.mxu0 %v2526_v40  ;;  %2296 = vmatpush3.bf16.msra.mxu0 %v2523_v37 }
  0x65   :  { %2297 = vmatprep.subr.bf16.mxu0 %v2532_v43 }
  0x68   :  { %2298 = vmatpush3.bf16.msra.mxu0 %v2532_v43 }
  0x69   :  { %2299 = vmatprep.subr.bf16.mxu0 %v2541_v50 }
  0x6a   :  { %1343 = vmatmul.mubr.bf16.gmra.mrb[36].mxu1 %v2528_v44 }
  0x6b   :  { %1602 = vmatmul.mubr.bf16.gmra.mrb[36].mxu0 %v2530_v45  ;;  %1350 = vmatprep.mubr.bf16.mxu1 %v2533_v46 }
  0x6c   :  { %1609 = vmatprep.mubr.bf16.mxu0 %v2535_v47  ;;  %2300 = vmatpush3.bf16.msra.mxu0 %v2541_v50 }
  0x6d   :  { %2301 = vmatprep.subr.bf16.mxu0 %v2550_v54 }
  0x70   :  { %2302 = vmatpush3.bf16.msra.mxu0 %v2550_v54 }
  0x71   :  { %2303 = vmatprep.subr.bf16.mxu0 %v2557_v58 }
  0x72   :  { %1351 = vmatmul.mubr.bf16.gmra.mrb[40].mxu1 %v2537_v51 }
  0x73   :  { %1610 = vmatmul.mubr.bf16.gmra.mrb[40].mxu0 %v2539_v55  ;;  %1358 = vmatprep.mubr.bf16.mxu1 %v2542_v56 }
  0x74   :  { %1617 = vmatprep.mubr.bf16.mxu0 %v2544_v57  ;;  %2304 = vmatpush3.bf16.msra.mxu0 %v2557_v58 }
  0x75   :  { %2305 = vmatprep.subr.bf16.mxu0 %v2564_v60 }
  0x78   :  { %2306 = vmatpush3.bf16.msra.mxu0 %v2564_v60 }
  0x79   :  { %2307 = vmatprep.subr.bf16.mxu0 %v2571_v0 }
  0x7a   :  { %1359 = vmatmul.mubr.bf16.gmra.mrb[44].mxu1 %v2546_v59 }
  0x7b   :  { %1618 = vmatmul.mubr.bf16.gmra.mrb[44].mxu0 %v2548_v61  ;;  %1496 = vmatprep.mubr.bf16.mxu1 %v2553_v62 }
  0x7c   :  { %1625 = vmatprep.mubr.bf16.mxu0 %v2554_v63  ;;  %2308 = vmatpush3.bf16.msra.mxu0 %v2571_v0 }
  0x7d   :  { %2309 = vmatprep.subr.bf16.mxu0 %v2578_v1 }
  0x80   :  { %2310 = vmatpush3.bf16.msra.mxu0 %v2578_v1 }
  0x82   :  { %1497 = vmatmul.mubr.bf16.vlgmr.msra.gmra.mrb[48].mxu1 %v2551_v2 }
  0x83   :  { %1626 = vmatmul.mubr.bf16.gmra.mrb[48].mxu0 %v2556_v3  ;;  %1504 = vmatprep.mubr.bf16.mxu1 %v2558_v4 }
  0x84   :  { %1633 = vmatprep.mubr.bf16.mxu0 %v2560_v5 }
  0x8a   :  { %1505 = vmatmul.mubr.bf16.gmra.mrb[52].mxu1 %v2562_v6 }
  0x8b   :  { %1634 = vmatmul.mubr.bf16.gmra.mrb[52].mxu0 %v2563_v7  ;;  %1512 = vmatprep.mubr.bf16.mxu1 %v2565_v8 }
  0x8c   :  { %1641 = vmatprep.mubr.bf16.mxu0 %v2567_v9 }
  0x92   :  { %1513 = vmatmul.mubr.bf16.gmra.mrb[56].mxu1 %v2569_v10 }
  0x93   :  { %1642 = vmatmul.mubr.bf16.gmra.mrb[56].mxu0 %v2570_v11  ;;  %1520 = vmatprep.mubr.bf16.mxu1 %v2572_v12 }
  0x94   :  { %1649 = vmatprep.mubr.bf16.mxu0 %v2574_v13 }
  0x9a   :  { %1521 = vmatmul.mubr.bf16.gmra.mrb[60].mxu1 %v2576_v14 }
  0x9b   :  { %1650 = vmatmul.mubr.bf16.gmra.mrb[60].mxu0 %v2577_v15  ;;  %1528 = vmatprep.mubr.bf16.mxu1 %v2579_v16 }
  0x9c   :  { %2311 = vmatprep.mubr.bf16.mxu0 %v2581_v17 }
  0xa2   :  { %1529 = vmatmul.mubr.bf16.gmra.mrb[64].mxu1 %v2582_v18 }
  0xa3   :  { %2312 = vmatmul.mubr.bf16.vlgmr.msra.gmra.mrb[64].mxu0 %v2583_v19  ;;  %1536 = vmatprep.mubr.bf16.mxu1 %v2584_v20 }
  0xa4   :  { %2315 = vmatprep.mubr.bf16.mxu0 %v2586_v21 }
  0xaa   :  { %1537 = vmatmul.mubr.bf16.gmra.mrb[68].mxu1 %v2587_v22 }
  0xab   :  { %2316 = vmatmul.mubr.bf16.gmra.mrb[68].mxu0 %v2588_v23  ;;  %1544 = vmatprep.mubr.bf16.mxu1 %v2589_v24 }
  0xac   :  { %2319 = vmatprep.mubr.bf16.mxu0 %v2591_v25 }
  0xb2   :  { %1545 = vmatmul.mubr.bf16.gmra.mrb[72].mxu1 %v2592_v26 }
  0xb3   :  { %2320 = vmatmul.mubr.bf16.gmra.mrb[72].mxu0 %v2593_v27  ;;  %1552 = vmatprep.mubr.bf16.mxu1 %v2594_v28 }
  0xb4   :  { %2323 = vmatprep.mubr.bf16.mxu0 %v2596_v29 }
  0xba   :  { %1553 = vmatmul.mubr.bf16.gmra.mrb[76].mxu1 %v2597_v30 }
  0xbb   :  { %2324 = vmatmul.mubr.bf16.gmra.mrb[76].mxu0 %v2598_v31 }
  0xf5   :  { %v3109_v32 = vpop.f32.mrb[0].mxu1 }
  0xf6   :  { %v407_v33 = vpop.f32.mrb[1].mxu1  ;;  %v2071_v34 = vpop.f32.mrb[0].mxu0 }
  0xf7   :  { %v3111_v35 = vpop.f32.mrb[2].mxu1  ;;  %v2072_v36 = vpop.f32.mrb[1].mxu0 }
  0xf8   :  { %v410_v37 = vpop.f32.mrb[3].mxu1  ;;  %v2073_v38 = vadd.f32 %v2072_v36, %v2071_v34  ;;  %v2074_v39 = vpop.f32.mrb[2].mxu0 }
  0xf9   :  { %v2075_v40 = vpop.f32.mrb[3].mxu0 }
  0xfa   :  { %v2076_v41 = vadd.f32 %v2075_v40, %v2074_v39 }
  0xfd   :  { %v3113_v42 = vpop.f32.mrb[4].mxu1 }
  0xfe   :  { %v3115_v43 = vpop.f32.mrb[5].mxu1  ;;  %v2077_v44 = vpop.f32.mrb[4].mxu0 }
  0xff   :  { %v3117_v45 = vpop.f32.mrb[6].mxu1  ;;  %v2078_v46 = vpop.f32.mrb[5].mxu0 }
 0x100   :  { %v3119_v47 = vpop.f32.mrb[7].mxu1  ;;  %v2079_v48 = vadd.f32 %v2078_v46, %v2077_v44  ;;  %v2080_v49 = vpop.f32.mrb[6].mxu0 }
 0x101   :  { %v2081_v50 = vpop.f32.mrb[7].mxu0 }
 0x102   :  { %v2082_v51 = vadd.f32 %v2081_v50, %v2080_v49 }
 0x105   :  { %v3121_v52 = vpop.f32.mrb[8].mxu1 }
 0x106   :  { %v3123_v53 = vpop.f32.mrb[9].mxu1  ;;  %v2083_v54 = vpop.f32.mrb[8].mxu0 }
 0x107   :  { %v3125_v55 = vpop.f32.mrb[10].mxu1  ;;  %v2084_v56 = vpop.f32.mrb[9].mxu0 }
 0x108   :  { %v3127_v57 = vpop.f32.mrb[11].mxu1  ;;  %v2085_v58 = vadd.f32 %v2084_v56, %v2083_v54  ;;  %v2086_v59 = vpop.f32.mrb[10].mxu0 }
 0x109   :  { %v2087_v60 = vpop.f32.mrb[11].mxu0 }
 0x10a   :  { %v2088_v61 = vadd.f32 %v2087_v60, %v2086_v59 }
 0x10d   :  { %v3129_v62 = vpop.f32.mrb[12].mxu1 }
 0x10e   :  { %v3131_v63 = vpop.f32.mrb[13].mxu1  ;;  %v2089_v0 = vpop.f32.mrb[12].mxu0 }
 0x10f   :  { %v3133_v1 = vpop.f32.mrb[14].mxu1  ;;  %v2090_v2 = vpop.f32.mrb[13].mxu0 }
 0x110   :  { %v3135_v3 = vpop.f32.mrb[15].mxu1  ;;  %v3137_v4 = vadd.f32 %v2090_v2, %v2089_v0  ;;  %v2092_v5 = vpop.f32.mrb[14].mxu0 }
 0x111   :  { %v2093_v6 = vpop.f32.mrb[15].mxu0 }
 0x112   :  { %v3139_v7 = vadd.f32 %v2093_v6, %v2092_v5 }
 0x115   :  { %v2007_v8 = vpop.f32.mrb[16].mxu1 }
 0x116   :  { %v2008_v9 = vpop.f32.mrb[17].mxu1  ;;  %v2095_v10 = vpop.f32.mrb[16].mxu0 }
 0x117   :  { %v2009_v11 = vadd.f32 %v2008_v9, %v2007_v8  ;;  %v2010_v12 = vpop.f32.mrb[18].mxu1  ;;  %v2096_v13 = vpop.f32.mrb[17].mxu0 }
 0x118   :  { %v2011_v14 = vpop.f32.mrb[19].mxu1  ;;  %v3141_v15 = vadd.f32 %v2096_v13, %v2095_v10  ;;  %v2098_v16 = vpop.f32.mrb[18].mxu0 }
 0x119   :  { %v1305_v17 = vadd.f32 %v2009_v11, %v407_v33  ;;  %v2012_v18 = vadd.f32 %v2011_v14, %v2010_v12  ;;  %v2099_v19 = vpop.f32.mrb[19].mxu0 }
 0x11a   :  { %v3143_v20 = vadd.f32 %v2099_v19, %v2098_v16 }
 0x11b   :  { %v1308_v21 = vadd.f32 %v2012_v18, %v410_v37  ;;  %v3145_v22 = vadd.f32 %v2073_v38, %v1305_v17 }
 0x11d   :  { %v2013_v23 = vpop.f32.mrb[20].mxu1  ;;  %v3147_v24 = vadd.f32 %v2076_v41, %v1308_v21 }
 0x11e   :  { %v2014_v25 = vpop.f32.mrb[21].mxu1  ;;  %v2101_v26 = vpop.f32.mrb[20].mxu0 }
 0x11f   :  { %v2015_v27 = vadd.f32 %v2014_v25, %v2013_v23  ;;  %v2016_v28 = vpop.f32.mrb[22].mxu1  ;;  %v2102_v29 = vpop.f32.mrb[21].mxu0 }
 0x120   :  { %v2017_v30 = vpop.f32.mrb[23].mxu1  ;;  %v3149_v31 = vadd.f32 %v2102_v29, %v2101_v26  ;;  %v2104_v34 = vpop.f32.mrb[22].mxu0 }
 0x121   :  { %v1313_v33 = vadd.f32 %v3109_v32, %v2015_v27  ;;  %v2018_v36 = vadd.f32 %v2017_v30, %v2016_v28  ;;  %v2105_v39 = vpop.f32.mrb[23].mxu0 }
 0x122   :  { %v3152_v40 = vadd.f32 %v2105_v39, %v2104_v34 }
 0x123   :  { %v1316_v37 = vadd.f32 %v3111_v35, %v2018_v36  ;;  %v3155_v38 = vadd.f32 %v2079_v48, %v1313_v33 }
 0x125   :  { %v2019_v41 = vpop.f32.mrb[24].mxu1  ;;  %v3157_v44 = vadd.f32 %v2082_v51, %v1316_v37 }
 0x126   :  { %v2020_v46 = vpop.f32.mrb[25].mxu1  ;;  %v2107_v49 = vpop.f32.mrb[24].mxu0 }
 0x127   :  { %v2021_v50 = vadd.f32 %v2020_v46, %v2019_v41  ;;  %v2022_v54 = vpop.f32.mrb[26].mxu1  ;;  %v2108_v56 = vpop.f32.mrb[25].mxu0 }
 0x128   :  { %v2023_v59 = vpop.f32.mrb[27].mxu1  ;;  %v3159_v60 = vadd.f32 %v2108_v56, %v2107_v49  ;;  %v2110_v32 = vpop.f32.mrb[26].mxu0 }
 0x129   :  { %v1321_v0 = vadd.f32 %v2021_v50, %v3115_v43  ;;  %v2024_v2 = vadd.f32 %v2023_v59, %v2022_v54  ;;  %v2111_v5 = vpop.f32.mrb[27].mxu0 }
 0x12a   :  { %v3162_v6 = vadd.f32 %v2111_v5, %v2110_v32 }
 0x12b   :  { %v1324_v35 = vadd.f32 %v2024_v2, %v3119_v47  ;;  %v3165_v48 = vadd.f32 %v2085_v58, %v1321_v0 }
 0x12d   :  { %v2025_v51 = vpop.f32.mrb[28].mxu1  ;;  %v3167_v8 = vadd.f32 %v2088_v61, %v1324_v35 }
 0x12e   :  { %v2026_v9 = vpop.f32.mrb[29].mxu1  ;;  %v2113_v10 = vpop.f32.mrb[28].mxu0 }
 0x12f   :  { %v2027_v11 = vadd.f32 %v2026_v9, %v2025_v51  ;;  %v2028_v12 = vpop.f32.mrb[30].mxu1  ;;  %v2114_v13 = vpop.f32.mrb[29].mxu0 }
 0x130   :  { %v2029_v14 = vpop.f32.mrb[31].mxu1  ;;  %v3169_v16 = vadd.f32 %v2114_v13, %v2113_v10  ;;  %v2116_v43 = vpop.f32.mrb[30].mxu0 }
 0x131   :  { %v1329_v17 = vadd.f32 %v3113_v42, %v2027_v11  ;;  %v2030_v18 = vadd.f32 %v2029_v14, %v2028_v12  ;;  %v2117_v19 = vpop.f32.mrb[31].mxu0 }
 0x132   :  { %v3172_v21 = vadd.f32 %v2117_v19, %v2116_v43 }
 0x133   :  { %v1332_v47 = vadd.f32 %v3117_v45, %v2030_v18  ;;  %v3176_v58 = vadd.f32 %v3137_v4, %v1329_v17 }
 0x135   :  { %v2031_v61 = vpop.f32.mrb[32].mxu1  ;;  %v3179_v23 = vadd.f32 %v3139_v7, %v1332_v47 }
 0x136   :  { %v2032_v25 = vpop.f32.mrb[33].mxu1  ;;  %v2199_v26 = vpop.f32.mrb[32].mxu0 }
 0x137   :  { %v2033_v27 = vadd.f32 %v2032_v25, %v2031_v61  ;;  %v2034_v28 = vpop.f32.mrb[34].mxu1  ;;  %v2200_v29 = vpop.f32.mrb[33].mxu0 }
 0x138   :  { %v2035_v30 = vpop.f32.mrb[35].mxu1  ;;  %v3181_v42 = vadd.f32 %v2200_v29, %v2199_v26  ;;  %v2202_v34 = vpop.f32.mrb[34].mxu0 }
 0x139   :  { %v1337_v33 = vadd.f32 %v2033_v27, %v3123_v53  ;;  %v2036_v36 = vadd.f32 %v2035_v30, %v2034_v28  ;;  %v2203_v45 = vpop.f32.mrb[35].mxu0 }
 0x13a   :  { %v3184_v39 = vadd.f32 %v2203_v45, %v2202_v34 }
 0x13b   :  { %v1340_v4 = vadd.f32 %v2036_v36, %v3127_v57  ;;  %v3188_v7 = vadd.f32 %v3141_v15, %v1337_v33 }
 0x13d   :  { %v2037_v37 = vpop.f32.mrb[36].mxu1  ;;  %v3191_v41 = vadd.f32 %v3143_v20, %v1340_v4 }
 0x13e   :  { %v2038_v46 = vpop.f32.mrb[37].mxu1  ;;  %v2205_v49 = vpop.f32.mrb[36].mxu0 }
 0x13f   :  { %v2039_v50 = vadd.f32 %v2038_v46, %v2037_v37  ;;  %v2040_v54 = vpop.f32.mrb[38].mxu1  ;;  %v2206_v56 = vpop.f32.mrb[37].mxu0 }
 0x140   :  { %v2041_v59 = vpop.f32.mrb[39].mxu1  ;;  %v3193_v53 = vadd.f32 %v2206_v56, %v2205_v49  ;;  %v2208_v32 = vpop.f32.mrb[38].mxu0 }
 0x141   :  { %v1345_v0 = vadd.f32 %v3121_v52, %v2039_v50  ;;  %v2042_v2 = vadd.f32 %v2041_v59, %v2040_v54  ;;  %v2209_v57 = vpop.f32.mrb[39].mxu0 }
 0x142   :  { %v3196_v5 = vadd.f32 %v2209_v57, %v2208_v32 }
 0x143   :  { %v1348_v15 = vadd.f32 %v3125_v55, %v2042_v2  ;;  %v3200_v20 = vadd.f32 %v3149_v31, %v1345_v0 }
 0x145   :  { %v2043_v35 = vpop.f32.mrb[40].mxu1  ;;  %v3203_v51 = vadd.f32 %v3152_v40, %v1348_v15 }
 0x146   :  { %v2044_v9 = vpop.f32.mrb[41].mxu1  ;;  %v2211_v10 = vpop.f32.mrb[40].mxu0 }
 0x147   :  { %v2045_v11 = vadd.f32 %v2044_v9, %v2043_v35  ;;  %v2046_v12 = vpop.f32.mrb[42].mxu1  ;;  %v2212_v13 = vpop.f32.mrb[41].mxu0 }
 0x148   :  { %v2047_v14 = vpop.f32.mrb[43].mxu1  ;;  %v3205_v52 = vadd.f32 %v2212_v13, %v2211_v10  ;;  %v2214_v43 = vpop.f32.mrb[42].mxu0 }
 0x149   :  { %v1353_v17 = vadd.f32 %v2045_v11, %v3131_v63  ;;  %v2048_v18 = vadd.f32 %v2047_v14, %v2046_v12  ;;  %v2215_v55 = vpop.f32.mrb[43].mxu0 }
 0x14a   :  { %v3208_v19 = vadd.f32 %v2215_v55, %v2214_v43 }
 0x14b   :  { %v1356_v31 = vadd.f32 %v2048_v18, %v3135_v3  ;;  %v3212_v40 = vadd.f32 %v3159_v60, %v1353_v17 }
 0x14d   :  { %v2049_v47 = vpop.f32.mrb[44].mxu1  ;;  %v3215_v61 = vadd.f32 %v3162_v6, %v1356_v31 }
 0x14e   :  { %v2050_v25 = vpop.f32.mrb[45].mxu1  ;;  %v2217_v26 = vpop.f32.mrb[44].mxu0 }
 0x14f   :  { %v2051_v27 = vadd.f32 %v2050_v25, %v2049_v47  ;;  %v2052_v28 = vpop.f32.mrb[46].mxu1  ;;  %v2218_v29 = vpop.f32.mrb[45].mxu0 }
 0x150   :  { %v2053_v30 = vpop.f32.mrb[47].mxu1  ;;  %v3217_v63 = vadd.f32 %v2218_v29, %v2217_v26  ;;  %v2220_v34 = vpop.f32.mrb[46].mxu0 }
 0x151   :  { %v1361_v33 = vadd.f32 %v3129_v62, %v2051_v27  ;;  %v2054_v36 = vadd.f32 %v2053_v30, %v2052_v28  ;;  %v2221_v3 = vpop.f32.mrb[47].mxu0 }
 0x152   :  { %v3220_v45 = vadd.f32 %v2221_v3, %v2220_v34 }
 0x153   :  { %v1364_v60 = vadd.f32 %v3133_v1, %v2054_v36  ;;  %v3224_v6 = vadd.f32 %v3169_v16, %v1361_v33 }
 0x155   :  { %v2135_v4 = vpop.f32.mrb[48].mxu1  ;;  %v3227_v37 = vadd.f32 %v3172_v21, %v1364_v60 }
 0x156   :  { %v2136_v46 = vpop.f32.mrb[49].mxu1  ;;  %v2223_v49 = vpop.f32.mrb[48].mxu0 }
 0x157   :  { %v2137_v50 = vadd.f32 %v2136_v46, %v2135_v4  ;;  %v2138_v54 = vpop.f32.mrb[50].mxu1  ;;  %v2224_v56 = vpop.f32.mrb[49].mxu0 }
 0x158   :  { %v2139_v59 = vpop.f32.mrb[51].mxu1  ;;  %v3229_v62 = vadd.f32 %v2224_v56, %v2223_v49  ;;  %v2226_v32 = vpop.f32.mrb[50].mxu0 }
 0x159   :  { %v1499_v0 = vadd.f32 %v2137_v50, %v3145_v22  ;;  %v2140_v2 = vadd.f32 %v2139_v59, %v2138_v54  ;;  %v2227_v1 = vpop.f32.mrb[51].mxu0 }
 0x15a   :  { %v3232_v57 = vadd.f32 %v2227_v1, %v2226_v32 }
 0x15b   :  { %v1502_v16 = vadd.f32 %v2140_v2, %v3147_v24  ;;  %v1596_v21 = vadd.f32 %v3181_v42, %v1499_v0 }
 0x15d   :  { %v2141_v15 = vpop.f32.mrb[52].mxu1  ;;  %v3237_v35 = vadd.f32 %v3184_v39, %v1502_v16 }
 0x15e   :  { %v2142_v9 = vpop.f32.mrb[53].mxu1  ;;  %v2229_v10 = vpop.f32.mrb[52].mxu0 }
 0x15f   :  { %v2143_v11 = vadd.f32 %v2142_v9, %v2141_v15  ;;  %v2144_v12 = vpop.f32.mrb[54].mxu1  ;;  %v2230_v13 = vpop.f32.mrb[53].mxu0 }
 0x160   :  { %v2145_v14 = vpop.f32.mrb[55].mxu1  ;;  %v3239_v43 = vadd.f32 %v2230_v13, %v2229_v10  ;;  %v2232_v22 = vpop.f32.mrb[54].mxu0  ;;  %v3268_v10 = vld [vmem:[%s3356_s4] ss:$0 sm:$0xff] }
 0x161   :  { %v1507_v17 = vadd.f32 %v2143_v11, %v3155_v38  ;;  %v2146_v18 = vadd.f32 %v2145_v14, %v2144_v12  ;;  %v2233_v55 = vpop.f32.mrb[55].mxu0 }
 0x162   :  { %v3242_v24 = vadd.f32 %v2233_v55, %v2232_v22 }
 0x163   :  { %v1510_v42 = vadd.f32 %v2146_v18, %v3157_v44  ;;  %v1604_v39 = vadd.f32 %v3193_v53, %v1507_v17 }
 0x165   :  { %v2147_v31 = vpop.f32.mrb[56].mxu1  ;;  %v1607_v47 = vadd.f32 %v3196_v5, %v1510_v42 }
 0x166   :  { %v2148_v25 = vpop.f32.mrb[57].mxu1  ;;  %v2235_v26 = vpop.f32.mrb[56].mxu0 }
 0x167   :  { %v2149_v27 = vadd.f32 %v2148_v25, %v2147_v31  ;;  %v2150_v28 = vpop.f32.mrb[58].mxu1  ;;  %v2236_v29 = vpop.f32.mrb[57].mxu0 }
 0x168   :  { %v2151_v30 = vpop.f32.mrb[59].mxu1  ;;  %v3247_v34 = vadd.f32 %v2236_v29, %v2235_v26  ;;  %v2238_v38 = vpop.f32.mrb[58].mxu0 }
 0x169   :  { %v1515_v33 = vadd.f32 %v2149_v27, %v3165_v48  ;;  %v2152_v36 = vadd.f32 %v2151_v30, %v2150_v28  ;;  %v2239_v3 = vpop.f32.mrb[59].mxu0 }
 0x16a   :  { %v3250_v60 = vadd.f32 %v2239_v3, %v2238_v38 }
 0x16b   :  { %v1518_v44 = vadd.f32 %v2152_v36, %v3167_v8  ;;  %v1612_v53 = vadd.f32 %v3205_v52, %v1515_v33 }
 0x16d   :  { %v2153_v5 = vpop.f32.mrb[60].mxu1  ;;  %v3255_v4 = vadd.f32 %v3208_v19, %v1518_v44 }
 0x16e   :  { %v2154_v46 = vpop.f32.mrb[61].mxu1  ;;  %v2241_v49 = vpop.f32.mrb[60].mxu0 }
 0x16f   :  { %v2155_v50 = vadd.f32 %v2154_v46, %v2153_v5  ;;  %v2156_v54 = vpop.f32.mrb[62].mxu1  ;;  %v2242_v56 = vpop.f32.mrb[61].mxu0 }
 0x170   :  { %v2157_v59 = vpop.f32.mrb[63].mxu1  ;;  %v3257_v32 = vadd.f32 %v2242_v56, %v2241_v49  ;;  %v2244_v48 = vpop.f32.mrb[62].mxu0 }
 0x171   :  { %v1523_v0 = vadd.f32 %v2155_v50, %v3176_v58  ;;  %v2158_v2 = vadd.f32 %v2157_v59, %v2156_v54  ;;  %v2245_v1 = vpop.f32.mrb[63].mxu0 }
 0x172   :  { %v3260_v8 = vadd.f32 %v2245_v1, %v2244_v48 }
 0x173   :  { %v1526_v52 = vadd.f32 %v2158_v2, %v3179_v23  ;;  %v1620_v19 = vadd.f32 %v3217_v63, %v1523_v0 }
 0x175   :  { %v2159_v16 = vpop.f32.mrb[64].mxu1  ;;  %v1623_v15 = vadd.f32 %v3220_v45, %v1526_v52 }
 0x176   :  { %v2313_v9 = vpop.f32.mrb[64].mxu0  ;;  %v2160_v11 = vpop.f32.mrb[65].mxu1 }
 0x177   :  { %v1701_v12 = vadd.f32 %v2313_v9, %v1604_v39  ;;  %v2161_v58 = vadd.f32 %v2160_v11, %v2159_v16  ;;  %v1692_v13 = vpop.f32.mrb[65].mxu0  ;;  %v2162_v14 = vpop.f32.mrb[66].mxu1 }
 0x178   :  { %v1693_v22 = vadd.f32 %v1692_v13, %v1596_v21  ;;  %v2314_v17 = vpop.f32.mrb[66].mxu0  ;;  %v2163_v18 = vpop.f32.mrb[67].mxu1 }
 0x179   :  { %v1764_v23 = vadd.f32 %v3268_v10, %v1701_v12  ;;  %v1531_v63 = vadd.f32 %v2161_v58, %v3188_v7  ;;  %v1704_v55 = vadd.f32 %v2314_v17, %v1607_v47  ;;  %v2164_v45 = vadd.f32 %v2163_v18, %v2162_v14  ;;  %v1695_v42 = vpop.f32.mrb[67].mxu0 }
 0x17a   :  { %v1762_v31 = vadd.f32 %v3268_v10, %v1693_v22  ;;  %v1696_v25 = vadd.f32 %v1695_v42, %v3237_v35 }
 0x17b   :  { %v1780_v26 = vmax.f32 %v1764_v23, 0.0  ;;  %v1765_v39 = vadd.f32 %v3268_v10, %v1704_v55  ;;  %v1534_v27 = vadd.f32 %v2164_v45, %v3191_v41  ;;  %v1628_v21 = vadd.f32 %v3229_v62, %v1531_v63 }
 0x17c   :  { %v1778_v28 = vmax.f32 %v1762_v31, 0.0  ;;  %v1763_v29 = vadd.f32 %v3268_v10, %v1696_v25 }
 0x17d   :  { %1796 = vst [vmem:[%s3357_s5 + $0x10] sm:$0xff] %v1780_v26  ;;  %v1781_v7 = vmax.f32 %v1765_v39, 0.0  ;;  %v2165_v47 = vpop.f32.mrb[68].mxu1  ;;  %v1631_v30 = vadd.f32 %v3232_v57, %v1534_v27 }
 0x17e   :  { %1794 = vst [vmem:[%s3357_s5] sm:$0xff] %v1778_v28  ;;  %v1779_v35 = vmax.f32 %v1763_v29, 0.0  ;;  %v2317_v38 = vpop.f32.mrb[68].mxu0  ;;  %v2166_v41 = vpop.f32.mrb[69].mxu1 }
 0x17f   :  { %1797 = vst [vmem:[%s3357_s5 + $0x18] sm:$0xff] %v1781_v7  ;;  %v1717_v62 = vadd.f32 %v2317_v38, %v1620_v19  ;;  %v2167_v33 = vadd.f32 %v2166_v41, %v2165_v47  ;;  %v1708_v36 = vpop.f32.mrb[69].mxu0  ;;  %v2168_v3 = vpop.f32.mrb[70].mxu1 }
 0x180   :  { %1795 = vst [vmem:[%s3357_s5 + $0x8] sm:$0xff] %v1779_v35  ;;  %v1709_v57 = vadd.f32 %v1708_v36, %v1612_v53  ;;  %v2318_v44 = vpop.f32.mrb[70].mxu0  ;;  %v2169_v5 = vpop.f32.mrb[71].mxu1 }
 0x181   :  { %v1768_v46 = vadd.f32 %v3268_v10, %v1717_v62  ;;  %v1539_v49 = vadd.f32 %v2167_v33, %v3200_v20  ;;  %v1720_v50 = vadd.f32 %v2318_v44, %v1623_v15  ;;  %v2170_v54 = vadd.f32 %v2169_v5, %v2168_v3  ;;  %v1711_v56 = vpop.f32.mrb[71].mxu0 }
 0x182   :  { %v1766_v59 = vadd.f32 %v3268_v10, %v1709_v57  ;;  %v1712_v48 = vadd.f32 %v1711_v56, %v3255_v4 }
 0x183   :  { %v1784_v0 = vmax.f32 %v1768_v46, 0.0  ;;  %v1769_v2 = vadd.f32 %v3268_v10, %v1720_v50  ;;  %v1542_v1 = vadd.f32 %v2170_v54, %v3203_v51  ;;  %v1636_v53 = vadd.f32 %v3239_v43, %v1539_v49 }
 0x184   :  { %v1782_v52 = vmax.f32 %v1766_v59, 0.0  ;;  %v1767_v19 = vadd.f32 %v3268_v10, %v1712_v48 }
 0x185   :  { %1800 = vst [vmem:[%s3357_s5 + $0x30] sm:$0xff] %v1784_v0  ;;  %v1785_v20 = vmax.f32 %v1769_v2, 0.0  ;;  %v2171_v16 = vpop.f32.mrb[72].mxu1  ;;  %v1639_v15 = vadd.f32 %v3242_v24, %v1542_v1 }
 0x186   :  { %1798 = vst [vmem:[%s3357_s5 + $0x20] sm:$0xff] %v1782_v52  ;;  %v1783_v4 = vmax.f32 %v1767_v19, 0.0  ;;  %v2321_v9 = vpop.f32.mrb[72].mxu0  ;;  %v2172_v51 = vpop.f32.mrb[73].mxu1 }
 0x187   :  { %1801 = vst [vmem:[%s3357_s5 + $0x38] sm:$0xff] %v1785_v20  ;;  %v1733_v43 = vadd.f32 %v2321_v9, %v1636_v53  ;;  %v2173_v11 = vadd.f32 %v2172_v51, %v2171_v16  ;;  %v1724_v12 = vpop.f32.mrb[73].mxu0  ;;  %v2174_v58 = vpop.f32.mrb[74].mxu1 }
 0x188   :  { %1799 = vst [vmem:[%s3357_s5 + $0x28] sm:$0xff] %v1783_v4  ;;  %v1725_v24 = vadd.f32 %v1724_v12, %v1628_v21  ;;  %v2322_v13 = vpop.f32.mrb[74].mxu0  ;;  %v2175_v14 = vpop.f32.mrb[75].mxu1 }
 0x189   :  { %v1772_v22 = vadd.f32 %v3268_v10, %v1733_v43  ;;  %v1547_v17 = vadd.f32 %v2173_v11, %v3212_v40  ;;  %v1736_v18 = vadd.f32 %v2322_v13, %v1639_v15  ;;  %v2176_v23 = vadd.f32 %v2175_v14, %v2174_v58  ;;  %v1727_v63 = vpop.f32.mrb[75].mxu0 }
 0x18a   :  { %v1770_v55 = vadd.f32 %v3268_v10, %v1725_v24  ;;  %v1728_v45 = vadd.f32 %v1727_v63, %v1631_v30 }
 0x18b   :  { %v1788_v42 = vmax.f32 %v1772_v22, 0.0  ;;  %v1773_v31 = vadd.f32 %v3268_v10, %v1736_v18  ;;  %v1550_v25 = vadd.f32 %v2176_v23, %v3215_v61  ;;  %v1644_v26 = vadd.f32 %v3247_v34, %v1547_v17 }
 0x18c   :  { %v1786_v39 = vmax.f32 %v1770_v55, 0.0  ;;  %v1771_v27 = vadd.f32 %v3268_v10, %v1728_v45 }
 0x18d   :  { %1804 = vst [vmem:[%s3357_s5 + $0x50] sm:$0xff] %v1788_v42  ;;  %v1789_v40 = vmax.f32 %v1773_v31, 0.0  ;;  %v2177_v21 = vpop.f32.mrb[76].mxu1  ;;  %v1647_v28 = vadd.f32 %v3250_v60, %v1550_v25 }
 0x18e   :  { %1802 = vst [vmem:[%s3357_s5 + $0x40] sm:$0xff] %v1786_v39  ;;  %v1787_v29 = vmax.f32 %v1771_v27, 0.0  ;;  %v2325_v7 = vpop.f32.mrb[76].mxu0  ;;  %v2178_v61 = vpop.f32.mrb[77].mxu1 }
 0x18f   :  { %1805 = vst [vmem:[%s3357_s5 + $0x58] sm:$0xff] %v1789_v40  ;;  %v2179_v34 = vadd.f32 %v2178_v61, %v2177_v21  ;;  %v1740_v47 = vpop.f32.mrb[77].mxu0  ;;  %v2180_v30 = vpop.f32.mrb[78].mxu1 }
 0x190   :  { %1803 = vst [vmem:[%s3357_s5 + $0x48] sm:$0xff] %v1787_v29  ;;  %v1741_v35 = vadd.f32 %v1740_v47, %v1644_v26  ;;  %v2326_v60 = vpop.f32.mrb[78].mxu0  ;;  %v2181_v38 = vpop.f32.mrb[79].mxu1 }
 0x191   :  { %v1555_v41 = vadd.f32 %v2179_v34, %v3224_v6  ;;  %v2182_v62 = vadd.f32 %v2181_v38, %v2180_v30  ;;  %v1743_v33 = vpop.f32.mrb[79].mxu0 }
 0x192   :  { %v1774_v36 = vadd.f32 %v3268_v10, %v1741_v35  ;;  %v1744_v3 = vadd.f32 %v1743_v33, %v1647_v28 }
 0x193   :  { %v1652_v57 = vadd.f32 %v3257_v32, %v1555_v41  ;;  %v1558_v44 = vadd.f32 %v2182_v62, %v3227_v37 }
 0x194   :  { %v1790_v5 = vmax.f32 %v1774_v36, 0.0  ;;  %v1775_v46 = vadd.f32 %v3268_v10, %v1744_v3 }
 0x195   :  { %v1749_v49 = vadd.f32 %v2325_v7, %v1652_v57  ;;  %v1655_v50 = vadd.f32 %v3260_v8, %v1558_v44 }
 0x196   :  { %1806 = vst [vmem:[%s3357_s5 + $0x60] sm:$0xff] %v1790_v5  ;;  %v1791_v6 = vmax.f32 %v1775_v46, 0.0 }
 0x197   :  { %v1776_v54 = vadd.f32 %v3268_v10, %v1749_v49  ;;  %v1752_v56 = vadd.f32 %v2326_v60, %v1655_v50 }
 0x198   :  { %1807 = vst [vmem:[%s3357_s5 + $0x68] sm:$0xff] %v1791_v6 }
 0x199   :  { %v1792_v32 = vmax.f32 %v1776_v54, 0.0  ;;  %v1777_v37 = vadd.f32 %v3268_v10, %v1752_v56 }
 0x19b   :  { %1808 = vst [vmem:[%s3357_s5 + $0x70] sm:$0xff] %v1792_v32  ;;  %v1793_v8 = vmax.f32 %v1777_v37, 0.0 }
 0x19d   :  { %1809 = vst [vmem:[%s3357_s5 + $0x78] sm:$0xff] %v1793_v8 }

</bundles_post_ra>
